<compile_context>
chip_gen: v7x
topology: tpu7x:2x2x1
jax: 0.10.0
libtpu: 0.0.40
codegen_flags: <defaults>
</compile_context>

<pallas_src>
import math
import functools

import jax
import jax.numpy as jnp
from jax.experimental import pallas as pl
from jax.experimental.pallas import tpu as pltpu


def _round_up(x, m):
    return ((x + m - 1) // m) * m


def _gcn_layer_kernel(x_ref, w_ref, adj_ref, b_ref, out_ref, acc_ref, *, apply_relu):
    """One grid step of out = (relu)(adj @ (x @ W) + b).

    Grid = (row_tiles, k_tiles); k (contraction over neighbor nodes) innermost.
      x_ref   : (tk, f_in)    node-feature slab for this k tile (compute dtype)
      w_ref   : (f_in, f_out) full weight, resident in VMEM     (compute dtype)
      adj_ref : (tm, tk)      adjacency tile                    (compute dtype)
      b_ref   : (1, f_out)    bias (f32), broadcast over sublanes
      out_ref : (tm, f_out)   f32 output tile, written on last k step
      acc_ref : (tm, f_out)   f32 accumulator scratch
    """
    k = pl.program_id(1)

    @pl.when(k == 0)
    def _():
        acc_ref[...] = jnp.zeros_like(acc_ref)

    # support_k = x_k @ W  (MXU, f32 accumulate), then adj_ik @ support_k.
    support = jnp.dot(x_ref[...], w_ref[...], preferred_element_type=jnp.float32)
    acc_ref[...] += jnp.dot(
        adj_ref[...], support.astype(adj_ref.dtype),
        preferred_element_type=jnp.float32)

    @pl.when(k == pl.num_programs(1) - 1)
    def _():
        out = acc_ref[...] + b_ref[...]
        if apply_relu:
            out = jnp.maximum(out, 0.0)
        out_ref[...] = out.astype(out_ref.dtype)


def gcn_layer(x, w, adj, b2d, *, apply_relu, node_tile, compute_dtype=jnp.float32):
    """(relu)(adj @ (x @ w) + b) on pre-padded inputs.

    x   : (n_pad, f_in_pad)      f_in_pad, f_out_pad multiples of 128
    w   : (f_in_pad, f_out_pad)
    adj : (n_pad, n_pad)         n_pad multiple of node_tile
    b2d : (1, f_out_pad)
    Returns f32 (n_pad, f_out_pad).
    """
    n_pad, f_in = x.shape
    f_out = w.shape[1]
    tm = tk = min(node_tile, n_pad)
    assert n_pad % tm == 0 and f_in % 128 == 0 and f_out % 128 == 0

    grid = (n_pad // tm, n_pad // tk)
    kernel = functools.partial(_gcn_layer_kernel, apply_relu=apply_relu)

    return pl.pallas_call(
        kernel,
        out_shape=jax.ShapeDtypeStruct((n_pad, f_out), jnp.float32),
        grid_spec=pltpu.PrefetchScalarGridSpec(
            num_scalar_prefetch=0,
            grid=grid,
            in_specs=[
                pl.BlockSpec((tk, f_in), lambda i, k: (k, 0)),     # x k-slab
                pl.BlockSpec((f_in, f_out), lambda i, k: (0, 0)),  # W (resident)
                pl.BlockSpec((tm, tk), lambda i, k: (i, k)),       # adj tile
                pl.BlockSpec((1, f_out), lambda i, k: (0, 0)),     # bias
            ],
            out_specs=pl.BlockSpec((tm, f_out), lambda i, k: (i, 0)),
            scratch_shapes=[pltpu.VMEM((tm, f_out), jnp.float32)],
        ),
        compiler_params=pltpu.CompilerParams(
            dimension_semantics=("parallel", "arbitrary")),
    )(x.astype(compute_dtype), w.astype(compute_dtype),
      adj.astype(compute_dtype), b2d.astype(jnp.float32))


def gcn_forward(x, adj, params, dropout=0.0, *, node_tile=256,
                compute_dtype=jnp.float32):
    """GCN.forward: returns (x2, x_)."""
    w1, b1, w2, b2 = params
    n, nfeat = x.shape
    nhid = w1.shape[1]

    # Pad node and feature dims (zero padding is exact: padded adj rows/cols
    # are zero, so padded nodes/features never contribute to real outputs).
    tm = min(node_tile, _round_up(n, 128))
    n_pad = _round_up(n, tm)
    nfeat_pad = _round_up(nfeat, 128)
    nhid_pad = _round_up(nhid, 128)

    def pad2(a, r, c):
        return jnp.pad(a, ((0, r - a.shape[0]), (0, c - a.shape[1])))

    x_p = pad2(x, n_pad, nfeat_pad)
    adj_p = pad2(adj, n_pad, n_pad)
    w1_p = pad2(w1, nfeat_pad, nhid_pad)
    w2_p = pad2(w2, nhid_pad, nfeat_pad)
    b1_p = jnp.pad(b1, (0, nhid_pad - nhid)).reshape(1, nhid_pad)
    b2_p = jnp.pad(b2, (0, nfeat_pad - nfeat)).reshape(1, nfeat_pad)

    hidden_p = gcn_layer(x_p, w1_p, adj_p, b1_p, apply_relu=True,
                         node_tile=tm, compute_dtype=compute_dtype)
    # nn.functional.dropout with p=0.0 is the identity.
    # TODO(synk): dropout>0 would use pltpu.prng_seed/prng_random_bits in-kernel.
    out_p = gcn_layer(hidden_p, w2_p, adj_p, b2_p, apply_relu=False,
                      node_tile=tm, compute_dtype=compute_dtype)

    x2 = out_p[:n, :nfeat]
    x_ = hidden_p[:n, :nhid]
    return x2, x_


def init_gcn_params(key, nfeat, nhid):
    """Deterministic init matching GraphConvolution.reset_parameters."""
    k1, k2, k3, k4 = jax.random.split(key, 4)
    stdv1 = 1.0 / math.sqrt(nhid)
    w1 = jax.random.uniform(k1, (nfeat, nhid), jnp.float32, -stdv1, stdv1)
    b1 = jax.random.uniform(k2, (nhid,), jnp.float32, -stdv1, stdv1)
    stdv2 = 1.0 / math.sqrt(nfeat)
    w2 = jax.random.uniform(k3, (nhid, nfeat), jnp.float32, -stdv2, stdv2)
    b2 = jax.random.uniform(k4, (nfeat,), jnp.float32, -stdv2, stdv2)
    return w1, b1, w2, b2


if __name__ == "__main__":
    key = jax.random.PRNGKey(0)
    kx, kadj, kp = jax.random.split(key, 3)

    # Small synthetic graph.  N=256 with node_tile=128 -> grid (2, 2), so the
    # tiled accumulator / pipelined path is actually exercised.
    N, NFEAT, NHID = 256, 32, 64
    NODE_TILE = 128

    x = jax.random.normal(kx, (N, NFEAT), jnp.float32)
    # Symmetric row-normalized adjacency (dense stand-in for the sparse adj).
    a = (jax.random.uniform(kadj, (N, N)) < 0.05).astype(jnp.float32)
    a = jnp.maximum(a, a.T) + jnp.eye(N, dtype=jnp.float32)
    adj = a / jnp.sum(a, axis=1, keepdims=True)

    params = init_gcn_params(kp, NFEAT, NHID)
    w1, b1, w2, b2 = params

    # --- f32 path (matches the PyTorch module's numerics) ---
    fwd_f32 = jax.jit(functools.partial(
        gcn_forward, node_tile=NODE_TILE, compute_dtype=jnp.float32))
    x2, x_hidden = fwd_f32(x, adj, params)
    jax.block_until_ready((x2, x_hidden))

    ref_hidden = jnp.maximum(adj @ (x @ w1) + b1, 0.0)
    ref_out = adj @ (ref_hidden @ w2) + b2
    assert x_hidden.shape == (N, NHID) and x2.shape == (N, NFEAT)
    assert jnp.allclose(x_hidden, ref_hidden, atol=1e-4, rtol=1e-4)
    assert jnp.allclose(x2, ref_out, atol=1e-4, rtol=1e-4)

    # --- bf16-operand / f32-accumulate path (v6e/v7x MXU-native) ---
    fwd_bf16 = jax.jit(functools.partial(
        gcn_forward, node_tile=NODE_TILE, compute_dtype=jnp.bfloat16))
    x2_bf, xh_bf = fwd_bf16(x, adj, params)
    jax.block_until_ready((x2_bf, xh_bf))
    assert float(jnp.max(jnp.abs(xh_bf - ref_hidden))) < 0.1
    assert float(jnp.max(jnp.abs(x2_bf - ref_out))) < 0.1

    print("KERNEL_OK")
</pallas_src>

<mosaic_0001>
module attributes {stable_mosaic.version = 11 : i64} {
  func.func @_gcn_layer_kernel(%arg0: i32, %arg1: i32, %arg2: memref<128x128xf32, #tpu.memory_space<vmem>>, %arg3: memref<128x128xf32, #tpu.memory_space<vmem>>, %arg4: memref<128x128xf32, #tpu.memory_space<vmem>>, %arg5: memref<1x128xf32, #tpu.memory_space<vmem>>, %arg6: memref<128x128xf32, #tpu.memory_space<vmem>>, %arg7: memref<128x128xf32, #tpu.memory_space<vmem>>) attributes {dimension_semantics = [#tpu.dimension_semantics<parallel>, #tpu.dimension_semantics<arbitrary>], iteration_bounds = array<i64: 2, 2>, scalar_prefetch = 0 : i64, scratch_operands = 1 : i64, tpu.core_type = #tpu.core_type<tc>, window_params = [{transform_indices = @transform_0, window_bounds = array<i64: 128, 128>}, {pipeline_mode = #tpu.pipeline_mode<synchronous>, transform_indices = @transform_1, window_bounds = array<i64: 128, 128>}, {transform_indices = @transform_2, window_bounds = array<i64: 128, 128>}, {pipeline_mode = #tpu.pipeline_mode<synchronous>, transform_indices = @transform_3, window_bounds = array<i64: 1, 128>}, {transform_indices = @transform_4, window_bounds = array<i64: 128, 128>}]} {
    %c0_i32 = arith.constant 0 : i32
    %0 = arith.cmpi eq, %arg1, %c0_i32 : i32
    %1 = arith.extui %0 : i1 to i32
    %c0_i32_0 = arith.constant 0 : i32
    %2 = arith.cmpi ne, %1, %c0_i32_0 : i32
    scf.if %2 {
      %cst_12 = arith.constant 0.000000e+00 : f32
      %14 = vector.broadcast %cst_12 : f32 to vector<128x128xf32>
      %c0_13 = arith.constant 0 : index
      %c0_14 = arith.constant 0 : index
      %15 = vector.load %arg7[%c0_13, %c0_14] : memref<128x128xf32, #tpu.memory_space<vmem>>, vector<128x128xf32>
      tpu.vector_store %arg7[%c0_13, %c0_14], %14 {strides = array<i32>} : memref<128x128xf32, #tpu.memory_space<vmem>>, vector<128x128xf32>,
    } else {
    }
    %c0 = arith.constant 0 : index
    %c0_1 = arith.constant 0 : index
    %3 = vector.load %arg2[%c0, %c0_1] : memref<128x128xf32, #tpu.memory_space<vmem>>, vector<128x128xf32>
    %c0_2 = arith.constant 0 : index
    %c0_3 = arith.constant 0 : index
    %4 = vector.load %arg3[%c0_2, %c0_3] : memref<128x128xf32, #tpu.memory_space<vmem>>, vector<128x128xf32>
    %cst = arith.constant dense<0.000000e+00> : vector<128x128xf32>
    %5 = tpu.matmul %3, %4, %cst {dimension_numbers = #tpu.dot_dimension_numbers<[1], [0], [0], [1], [0, 0, 1, 1], [], []>} : vector<128x128xf32>, vector<128x128xf32>, vector<128x128xf32> -> vector<128x128xf32>
    %c0_4 = arith.constant 0 : index
    %c0_5 = arith.constant 0 : index
    %6 = vector.load %arg7[%c0_4, %c0_5] : memref<128x128xf32, #tpu.memory_space<vmem>>, vector<128x128xf32>
    %c0_6 = arith.constant 0 : index
    %c0_7 = arith.constant 0 : index
    %7 = vector.load %arg4[%c0_6, %c0_7] : memref<128x128xf32, #tpu.memory_space<vmem>>, vector<128x128xf32>
    %cst_8 = arith.constant dense<0.000000e+00> : vector<128x128xf32>
    %8 = tpu.matmul %7, %5, %cst_8 {dimension_numbers = #tpu.dot_dimension_numbers<[1], [0], [0], [1], [0, 0, 1, 1], [], []>} : vector<128x128xf32>, vector<128x128xf32>, vector<128x128xf32> -> vector<128x128xf32>
    %9 = arith.addf %6, %8 : vector<128x128xf32>
    %c0_9 = arith.constant 0 : index
    %c0_10 = arith.constant 0 : index
    %10 = vector.load %arg7[%c0_9, %c0_10] : memref<128x128xf32, #tpu.memory_space<vmem>>, vector<128x128xf32>
    tpu.vector_store %arg7[%c0_9, %c0_10], %9 {strides = array<i32>} : memref<128x128xf32, #tpu.memory_space<vmem>>, vector<128x128xf32>,
    %c1_i32 = arith.constant 1 : i32
    %11 = arith.cmpi eq, %arg1, %c1_i32 : i32
    %12 = arith.extui %11 : i1 to i32
    %c0_i32_11 = arith.constant 0 : i32
    %13 = arith.cmpi ne, %12, %c0_i32_11 : i32
    scf.if %13 {
      %c0_12 = arith.constant 0 : index
      %c0_13 = arith.constant 0 : index
      %14 = vector.load %arg7[%c0_12, %c0_13] : memref<128x128xf32, #tpu.memory_space<vmem>>, vector<128x128xf32>
      %c0_14 = arith.constant 0 : index
      %c0_15 = arith.constant 0 : index
      %15 = vector.load %arg5[%c0_14, %c0_15] : memref<1x128xf32, #tpu.memory_space<vmem>>, vector<1x128xf32>
      %16 = vector.broadcast %15 : vector<1x128xf32> to vector<128x128xf32>
      %17 = arith.addf %14, %16 : vector<128x128xf32>
      %cst_16 = arith.constant 0.000000e+00 : f32
      %18 = vector.broadcast %cst_16 : f32 to vector<128x128xf32>
      %19 = arith.maximumf %17, %18 : vector<128x128xf32>
      %c0_17 = arith.constant 0 : index
      %c0_18 = arith.constant 0 : index
      %20 = vector.load %arg6[%c0_17, %c0_18] : memref<128x128xf32, #tpu.memory_space<vmem>>, vector<128x128xf32>
      tpu.vector_store %arg6[%c0_17, %c0_18], %19 {strides = array<i32>} : memref<128x128xf32, #tpu.memory_space<vmem>>, vector<128x128xf32>,
    } else {
    }
    return
  }
  func.func @transform_0(%arg0: i32, %arg1: i32) -> (i32, i32) {
    %c0_i32 = arith.constant 0 : i32
    %c0_i32_0 = arith.constant 0 : i32
    return %arg1, %c0_i32 : i32, i32
  }
  func.func @transform_1(%arg0: i32, %arg1: i32) -> (i32, i32) {
    %c0_i32 = arith.constant 0 : i32
    %c0_i32_0 = arith.constant 0 : i32
    %c0_i32_1 = arith.constant 0 : i32
    return %c0_i32, %c0_i32_0 : i32, i32
  }
  func.func @transform_2(%arg0: i32, %arg1: i32) -> (i32, i32) {
    %c0_i32 = arith.constant 0 : i32
    return %arg0, %arg1 : i32, i32
  }
  func.func @transform_3(%arg0: i32, %arg1: i32) -> (i32, i32) {
    %c0_i32 = arith.constant 0 : i32
    %c0_i32_0 = arith.constant 0 : i32
    %c0_i32_1 = arith.constant 0 : i32
    return %c0_i32, %c0_i32_0 : i32, i32
  }
  func.func @transform_4(%arg0: i32, %arg1: i32) -> (i32, i32) {
    %c0_i32 = arith.constant 0 : i32
    %c0_i32_0 = arith.constant 0 : i32
    return %arg0, %c0_i32 : i32, i32
  }
}

module attributes {stable_mosaic.version = 11 : i64} {
  func.func @_gcn_layer_kernel(%arg0: i32, %arg1: i32, %arg2: memref<128x128xf32, #tpu.memory_space<vmem>>, %arg3: memref<128x128xf32, #tpu.memory_space<vmem>>, %arg4: memref<128x128xf32, #tpu.memory_space<vmem>>, %arg5: memref<1x128xf32, #tpu.memory_space<vmem>>, %arg6: memref<128x128xf32, #tpu.memory_space<vmem>>, %arg7: memref<128x128xf32, #tpu.memory_space<vmem>>) attributes {dimension_semantics = [#tpu.dimension_semantics<parallel>, #tpu.dimension_semantics<arbitrary>], iteration_bounds = array<i64: 2, 2>, scalar_prefetch = 0 : i64, scratch_operands = 1 : i64, tpu.core_type = #tpu.core_type<tc>, window_params = [{transform_indices = @transform_0, window_bounds = array<i64: 128, 128>}, {pipeline_mode = #tpu.pipeline_mode<synchronous>, transform_indices = @transform_1, window_bounds = array<i64: 128, 128>}, {transform_indices = @transform_2, window_bounds = array<i64: 128, 128>}, {pipeline_mode = #tpu.pipeline_mode<synchronous>, transform_indices = @transform_3, window_bounds = array<i64: 1, 128>}, {transform_indices = @transform_4, window_bounds = array<i64: 128, 128>}]} {
    %c0_i32 = arith.constant 0 : i32
    %0 = arith.cmpi eq, %arg1, %c0_i32 : i32
    %1 = arith.extui %0 : i1 to i32
    %c0_i32_0 = arith.constant 0 : i32
    %2 = arith.cmpi ne, %1, %c0_i32_0 : i32
    scf.if %2 {
      %cst_12 = arith.constant 0.000000e+00 : f32
      %14 = vector.broadcast %cst_12 : f32 to vector<128x128xf32>
      %c0_13 = arith.constant 0 : index
      %c0_14 = arith.constant 0 : index
      %15 = vector.load %arg7[%c0_13, %c0_14] : memref<128x128xf32, #tpu.memory_space<vmem>>, vector<128x128xf32>
      tpu.vector_store %arg7[%c0_13, %c0_14], %14 {strides = array<i32>} : memref<128x128xf32, #tpu.memory_space<vmem>>, vector<128x128xf32>,
    } else {
    }
    %c0 = arith.constant 0 : index
    %c0_1 = arith.constant 0 : index
    %3 = vector.load %arg2[%c0, %c0_1] : memref<128x128xf32, #tpu.memory_space<vmem>>, vector<128x128xf32>
    %c0_2 = arith.constant 0 : index
    %c0_3 = arith.constant 0 : index
    %4 = vector.load %arg3[%c0_2, %c0_3] : memref<128x128xf32, #tpu.memory_space<vmem>>, vector<128x128xf32>
    %cst = arith.constant dense<0.000000e+00> : vector<128x128xf32>
    %5 = tpu.matmul %3, %4, %cst {dimension_numbers = #tpu.dot_dimension_numbers<[1], [0], [0], [1], [0, 0, 1, 1], [], []>} : vector<128x128xf32>, vector<128x128xf32>, vector<128x128xf32> -> vector<128x128xf32>
    %c0_4 = arith.constant 0 : index
    %c0_5 = arith.constant 0 : index
    %6 = vector.load %arg7[%c0_4, %c0_5] : memref<128x128xf32, #tpu.memory_space<vmem>>, vector<128x128xf32>
    %c0_6 = arith.constant 0 : index
    %c0_7 = arith.constant 0 : index
    %7 = vector.load %arg4[%c0_6, %c0_7] : memref<128x128xf32, #tpu.memory_space<vmem>>, vector<128x128xf32>
    %cst_8 = arith.constant dense<0.000000e+00> : vector<128x128xf32>
    %8 = tpu.matmul %7, %5, %cst_8 {dimension_numbers = #tpu.dot_dimension_numbers<[1], [0], [0], [1], [0, 0, 1, 1], [], []>} : vector<128x128xf32>, vector<128x128xf32>, vector<128x128xf32> -> vector<128x128xf32>
    %9 = arith.addf %6, %8 : vector<128x128xf32>
    %c0_9 = arith.constant 0 : index
    %c0_10 = arith.constant 0 : index
    %10 = vector.load %arg7[%c0_9, %c0_10] : memref<128x128xf32, #tpu.memory_space<vmem>>, vector<128x128xf32>
    tpu.vector_store %arg7[%c0_9, %c0_10], %9 {strides = array<i32>} : memref<128x128xf32, #tpu.memory_space<vmem>>, vector<128x128xf32>,
    %c1_i32 = arith.constant 1 : i32
    %11 = arith.cmpi eq, %arg1, %c1_i32 : i32
    %12 = arith.extui %11 : i1 to i32
    %c0_i32_11 = arith.constant 0 : i32
    %13 = arith.cmpi ne, %12, %c0_i32_11 : i32
    scf.if %13 {
      %c0_12 = arith.constant 0 : index
      %c0_13 = arith.constant 0 : index
      %14 = vector.load %arg7[%c0_12, %c0_13] : memref<128x128xf32, #tpu.memory_space<vmem>>, vector<128x128xf32>
      %c0_14 = arith.constant 0 : index
      %c0_15 = arith.constant 0 : index
      %15 = vector.load %arg5[%c0_14, %c0_15] : memref<1x128xf32, #tpu.memory_space<vmem>>, vector<1x128xf32>
      %16 = vector.broadcast %15 : vector<1x128xf32> to vector<128x128xf32>
      %17 = arith.addf %14, %16 : vector<128x128xf32>
      %c0_16 = arith.constant 0 : index
      %c0_17 = arith.constant 0 : index
      %18 = vector.load %arg6[%c0_16, %c0_17] : memref<128x128xf32, #tpu.memory_space<vmem>>, vector<128x128xf32>
      tpu.vector_store %arg6[%c0_16, %c0_17], %17 {strides = array<i32>} : memref<128x128xf32, #tpu.memory_space<vmem>>, vector<128x128xf32>,
    } else {
    }
    return
  }
  func.func @transform_0(%arg0: i32, %arg1: i32) -> (i32, i32) {
    %c0_i32 = arith.constant 0 : i32
    %c0_i32_0 = arith.constant 0 : i32
    return %arg1, %c0_i32 : i32, i32
  }
  func.func @transform_1(%arg0: i32, %arg1: i32) -> (i32, i32) {
    %c0_i32 = arith.constant 0 : i32
    %c0_i32_0 = arith.constant 0 : i32
    %c0_i32_1 = arith.constant 0 : i32
    return %c0_i32, %c0_i32_0 : i32, i32
  }
  func.func @transform_2(%arg0: i32, %arg1: i32) -> (i32, i32) {
    %c0_i32 = arith.constant 0 : i32
    return %arg0, %arg1 : i32, i32
  }
  func.func @transform_3(%arg0: i32, %arg1: i32) -> (i32, i32) {
    %c0_i32 = arith.constant 0 : i32
    %c0_i32_0 = arith.constant 0 : i32
    %c0_i32_1 = arith.constant 0 : i32
    return %c0_i32, %c0_i32_0 : i32, i32
  }
  func.func @transform_4(%arg0: i32, %arg1: i32) -> (i32, i32) {
    %c0_i32 = arith.constant 0 : i32
    %c0_i32_0 = arith.constant 0 : i32
    return %arg0, %c0_i32 : i32, i32
  }
}

</mosaic_0001>

<bundles_post_ra>
// kernel: gcn_forward.2
= control target key start
LH: loop header
LB: loop body
LE: loop exit
PB: predicated region body
PF: predicated region fallthrough
CT: control target
= control target key end

     0   :  { %s1301_s15 = smov 0   ;;  %s1303_s16 = smov 0   ;;  %s1518_s0 = inlined_call_operand.vmem [shape: f32[256,128], index: 0, kind: input, shape index: {}]   ;;  %s1519_s1 = inlined_call_operand.vmem [shape: f32[128,128], index: 1, kind: input, shape index: {}]   ;;  %s1520_s2 = inlined_call_operand.vmem [shape: f32[256,256], index: 2, kind: input, shape index: {}]   ;;  %s1521_s3 = inlined_call_operand.vmem [shape: f32[1,128], index: 3, kind: input, shape index: {}]   ;;  %s1522_s4 = inlined_call_operand.vmem [shape: f32[256,128], index: 4, kind: output, shape index: {}]  }
   0x1   :  { %s1305_s17 = smov 0   ;;  %s1307_s18 = smov 0  }
   0x2   :  { %s1309_s19 = smov 0   ;;  %s1311_s20 = smov 0  }
   0x3   :  { %s1313_s21 = smov 0  }
   0x4 LB: > { %s23_s22 = sadd.s32 1, %s1265_s19  ;;  %s26_s23 = sadd.s32 1, %s1269_s20  ;;  %s1273_s21 = sphi %s1313_s21, %s14_s21   ;;  %s1269_s20 = sphi %s1311_s20, %s1528_s20   ;;  %s1265_s19 = sphi %s1309_s19, %s1527_s19   ;;  %s1261_s18 = sphi %s1307_s18, %s1526_s18   ;;  %s1257_s17 = sphi %s1305_s17, %s1525_s17   ;;  %s1253_s16 = sphi %s1303_s16, %s1524_s16   ;;  %s1249_s15 = sphi %s1301_s15, %s1523_s15  }
   0x5   : > { %p24_p0 = scmp.ge.s32.totalorder %s23_s22, 2  ;;  %p89_p1 = scmp.ne.s32.totalorder %s1253_s16, %s1249_s15 }
   0x6   : > { %p90_p2 = scmp.eq.s32.totalorder %s1273_s21, 0  ;;  %s82_s27 = sadd.s32 1, %s1253_s16 }
   0x7   : > { %s1530_s22 = smov (%p24_p0, %s23_s22), 0  ;;  %s1532_s23 = smov (!%p24_p0, %s26_s23), %s1269_s20 }
   0x8   : > { %p91_p3 = por %p90_p2, %p89_p1  ;;  %p28_p4 = scmp.ge.s32.totalorder %s1532_s23, 2 }
   0x9   : > { %s78_s24 = ssub.s32 %s1265_s19, %s1530_s22  ;;  %p905_p6 = scmp.ge.s32.totalorder %s1273_s21, 4 }
   0xa   : > { %s1534_s23 = smov (%p28_p4, %s1532_s23), 0 }
   0xb   : > { %s77_s25 = ssub.s32 %s1269_s20, %s1534_s23  ;;  %168 = sbr.rel (%p905_p6) target bundleno = 32 (0x20), region = 24 }
   0xc   : > { %s79_s26 = sor.u32 %s78_s24, %s77_s25 }
   0xd   : > { %p80_p5 = scmp.eq.s32.totalorder %s79_s26, 0 }
   0xf   : > { %s1352_s28 = scalar_select %p80_p5, %s1253_s16, %s82_s27  }
  0x12   : > { %180 = sbr.rel (!%p91_p3) target bundleno = 32 (0x20), region = 32  ;;  %s182_s29 = sand.u32 (%p91_p3), 1, %s1253_s16  }
  0x13   : > { %s921_s30 = sshll.u32 (%p91_p3), %s1269_s20, 5  ;;  %s906_s5 = sshll.u32 (%p91_p3), %s182_s29, 7 }
  0x14   : > { %s187_s6 = sadd.s32 (%p91_p3), %s1265_s19, %s921_s30  ;;  %s184_s11 = scalar_lea.vmem (%p91_p3), [#allocation3], %s906_s5 }
  0x15   : > { %s909_s7 = sshll.u32 (%p91_p3), %s187_s6, 3 }
  0x16   : > { %s1361_s10 = scalar_lea.vmem (%p91_p3), %s1520_s2, %s909_s7 }
  0x17   : > { %v247_v0 = vld [vmem:[%s1361_s10] sm:$0xff] (%p91_p3)  ;;  %v249_v1 = vld [vmem:[%s1361_s10 + $0x10] sm:$0xff] (%p91_p3) }
  0x18   : > { %v251_v2 = vld [vmem:[%s1361_s10 + $0x20] sm:$0xff] (%p91_p3)  ;;  %248 = vst [vmem:[%s184_s11] sm:$0xff] (%p91_p3), %v247_v0  ;;  %250 = vst [vmem:[%s184_s11 + $0x8] sm:$0xff] (%p91_p3), %v249_v1  ;;  %v253_v3 = vld [vmem:[%s1361_s10 + $0x30] sm:$0xff] (%p91_p3) }
  0x19   : > { %252 = vst [vmem:[%s184_s11 + $0x10] sm:$0xff] %v251_v2  ;;  %v255_v4 = vld [vmem:[%s1361_s10 + $0x40] sm:$0xff]  ;;  %v257_v5 = vld [vmem:[%s1361_s10 + $0x50] sm:$0xff]  ;;  %254 = vst [vmem:[%s184_s11 + $0x18] sm:$0xff] %v253_v3 }
  0x1a   : > { %256 = vst [vmem:[%s184_s11 + $0x20] sm:$0xff] %v255_v4  ;;  %258 = vst [vmem:[%s184_s11 + $0x28] sm:$0xff] %v257_v5  ;;  %v259_v6 = vld [vmem:[%s1361_s10 + $0x60] sm:$0xff]  ;;  %v261_v7 = vld [vmem:[%s1361_s10 + $0x70] sm:$0xff] }
  0x1b   : > { %v263_v8 = vld [vmem:[%s1361_s10 + $0x80] sm:$0xff]  ;;  %260 = vst [vmem:[%s184_s11 + $0x30] sm:$0xff] %v259_v6  ;;  %262 = vst [vmem:[%s184_s11 + $0x38] sm:$0xff] %v261_v7  ;;  %v265_v9 = vld [vmem:[%s1361_s10 + $0x90] sm:$0xff] }
  0x1c   : > { %264 = vst [vmem:[%s184_s11 + $0x40] sm:$0xff] %v263_v8  ;;  %v267_v10 = vld [vmem:[%s1361_s10 + $0xa0] sm:$0xff]  ;;  %v269_v11 = vld [vmem:[%s1361_s10 + $0xb0] sm:$0xff]  ;;  %266 = vst [vmem:[%s184_s11 + $0x48] sm:$0xff] %v265_v9 }
  0x1d   : > { %268 = vst [vmem:[%s184_s11 + $0x50] sm:$0xff] %v267_v10  ;;  %270 = vst [vmem:[%s184_s11 + $0x58] sm:$0xff] %v269_v11  ;;  %v271_v12 = vld [vmem:[%s1361_s10 + $0xc0] sm:$0xff]  ;;  %v273_v13 = vld [vmem:[%s1361_s10 + $0xd0] sm:$0xff] }
  0x1e   : > { %v275_v14 = vld [vmem:[%s1361_s10 + $0xe0] sm:$0xff]  ;;  %272 = vst [vmem:[%s184_s11 + $0x60] sm:$0xff] %v271_v12  ;;  %274 = vst [vmem:[%s184_s11 + $0x68] sm:$0xff] %v273_v13  ;;  %v277_v15 = vld [vmem:[%s1361_s10 + $0xf0] sm:$0xff] }
  0x1f   : > { %276 = vst [vmem:[%s184_s11 + $0x70] sm:$0xff] %v275_v14  ;;  %278 = vst [vmem:[%s184_s11 + $0x78] sm:$0xff] %v277_v15 }
  0x20 PF: > { %p910_p7 = scmp.ge.s32.totalorder %s1273_s21, 1  ;;  %p283_p8 = scmp.lt.s32.totalorder %s1273_s21, 5 }
  0x22   : > { %p284_p9 = pnand %p910_p7, %p283_p8 }
  0x23   : > { %s290_s12 = sand.u32 (!%p284_p9), 1, %s1249_s15   ;;  %s912_s13 = sshll.u32 (!%p284_p9), %s1257_s17, 4 }
  0x24   : > { %287 = sbr.rel (%p284_p9) target bundleno = 591 (0x24f), region = 70  ;;  %s911_s14 = sshll.u32 (!%p284_p9), %s290_s12, 7 }
  0x25   : > { %p321_p10 = scmp.lt.s32.totalorder (!%p284_p9), %s912_s13, 31  ;;  %s914_s24 = sshll.u32 (!%p284_p9), %s1261_s18, 4 }
  0x26   : > { %p328_p11 = scmp.lt.s32.totalorder (!%p284_p9), %s914_s24, 31  ;;  %s1394_s15 = scalar_lea.vmem (!%p284_p9), [#allocation3], %s911_s14 }
  0x27   : > { %p916_p12 = scmp.ne.s32.totalorder (!%p284_p9), %s1257_s17, 0 }
  0x2b   : > { %s1536_s13 = smov (!%p321_p10, %s912_s13), 31  ;;  %s1538_s24 = smov (!%p328_p11, %s914_s24), 31 }
  0x2c   : > { %s913_s25 = sshll.u32 %s1536_s13, 3  ;;  %s915_s30 = sshll.u32 %s1538_s24, 3  ;;  %v1275_v16 = vmov (!%p916_p12), 0.0  }
  0x2d   : > { %s1387_s29 = scalar_lea.vmem %s1518_s0, %s913_s25  ;;  %s1392_s7 = scalar_lea.vmem %s1522_s4, %s915_s30  ;;  %337 = vst [vmem:[#allocation2] sm:$0xff] (!%p916_p12), %v1275_v16  ;;  %338 = vst [vmem:[#allocation2 + $0x8] sm:$0xff] (!%p916_p12), %v1275_v16 }
  0x2e   : > { %336 = sbr.rel (%p916_p12) target bundleno = 53 (0x35), region = 78  ;;  %339 = vst [vmem:[#allocation2 + $0x10] sm:$0xff] (!%p916_p12), %v1275_v16  ;;  %340 = vst [vmem:[#allocation2 + $0x18] sm:$0xff] (!%p916_p12), %v1275_v16 }
  0x2f   : > { %341 = vst [vmem:[#allocation2 + $0x20] sm:$0xff] (!%p916_p12), %v1275_v16  ;;  %342 = vst [vmem:[#allocation2 + $0x28] sm:$0xff] (!%p916_p12), %v1275_v16 }
  0x30   : > { %343 = vst [vmem:[#allocation2 + $0x30] sm:$0xff] (!%p916_p12), %v1275_v16  ;;  %344 = vst [vmem:[#allocation2 + $0x38] sm:$0xff] (!%p916_p12), %v1275_v16 }
  0x31   : > { %345 = vst [vmem:[#allocation2 + $0x40] sm:$0xff] (!%p916_p12), %v1275_v16  ;;  %346 = vst [vmem:[#allocation2 + $0x48] sm:$0xff] (!%p916_p12), %v1275_v16 }
  0x32   : > { %347 = vst [vmem:[#allocation2 + $0x50] sm:$0xff] (!%p916_p12), %v1275_v16  ;;  %348 = vst [vmem:[#allocation2 + $0x58] sm:$0xff] (!%p916_p12), %v1275_v16 }
  0x33   : > { %349 = vst [vmem:[#allocation2 + $0x60] sm:$0xff] (!%p916_p12), %v1275_v16  ;;  %350 = vst [vmem:[#allocation2 + $0x68] sm:$0xff] (!%p916_p12), %v1275_v16 }
  0x34   : > { %351 = vst [vmem:[#allocation2 + $0x70] sm:$0xff] (!%p916_p12), %v1275_v16  ;;  %352 = vst [vmem:[#allocation2 + $0x78] sm:$0xff] (!%p916_p12), %v1275_v16 }
  0x35 PF: > { %v369_v17 = vld [vmem:[%s1519_s1] sm:$0xff]  ;;  %v370_v18 = vld [vmem:[%s1519_s1 + $0x8] sm:$0xff]  ;;  %v371_v19 = vld [vmem:[%s1519_s1 + $0x10] sm:$0xff]  ;;  %p917_p13 = scmp.ne.s32.totalorder %s1257_s17, 1 }
  0x36   : > { %v1098_v20 = vpack.c.bf16 %v370_v18, %v369_v17  ;;  %v372_v21 = vld [vmem:[%s1519_s1 + $0x18] sm:$0xff]  ;;  %v373_v23 = vld [vmem:[%s1519_s1 + $0x20] sm:$0xff]  ;;  %v374_v24 = vld [vmem:[%s1519_s1 + $0x28] sm:$0xff] }
  0x37   : > { %v1102_v22 = vpack.c.bf16 %v372_v21, %v371_v19  ;;  %v1106_v25 = vpack.c.bf16 %v374_v24, %v373_v23  ;;  %v353_v26 = vld [vmem:[%s1387_s29] sm:$0xff]  ;;  %v375_v27 = vld [vmem:[%s1519_s1 + $0x30] sm:$0xff]  ;;  %v376_v28 = vld [vmem:[%s1519_s1 + $0x38] sm:$0xff] }
  0x38   : > { %1099 = vmatprep.subr.bf16.mxu0 %v1098_v20  ;;  %1018 = vmatprep.mubr.f32.mxu0 %v353_v26  ;;  %v1110_v29 = vpack.c.bf16 %v376_v28, %v375_v27  ;;  %v377_v30 = vld [vmem:[%s1519_s1 + $0x40] sm:$0xff]  ;;  %v378_v31 = vld [vmem:[%s1519_s1 + $0x48] sm:$0xff]  ;;  %v379_v33 = vld [vmem:[%s1519_s1 + $0x50] sm:$0xff] }
  0x39   : > { %1101 = vmatpush3.bf16.msra.mxu0 %v1098_v20  ;;  %v1114_v32 = vpack.c.bf16 %v378_v31, %v377_v30  ;;  %v380_v34 = vld [vmem:[%s1519_s1 + $0x58] sm:$0xff]  ;;  %v381_v36 = vld [vmem:[%s1519_s1 + $0x60] sm:$0xff]  ;;  %v382_v37 = vld [vmem:[%s1519_s1 + $0x68] sm:$0xff] }
  0x3a   : > { %1103 = vmatprep.subr.bf16.mxu0 %v1102_v22  ;;  %v1118_v35 = vpack.c.bf16 %v380_v34, %v379_v33  ;;  %v1122_v38 = vpack.c.bf16 %v382_v37, %v381_v36  ;;  %v383_v39 = vld [vmem:[%s1519_s1 + $0x70] sm:$0xff]  ;;  %v384_v40 = vld [vmem:[%s1519_s1 + $0x78] sm:$0xff]  ;;  %v354_v42 = vld [vmem:[%s1387_s29 + $0x8] sm:$0xff] }
  0x3b   : > { %v1126_v41 = vpack.c.bf16 %v384_v40, %v383_v39  ;;  %v355_v43 = vld [vmem:[%s1387_s29 + $0x10] sm:$0xff]  ;;  %v356_v44 = vld [vmem:[%s1387_s29 + $0x18] sm:$0xff]  ;;  %v357_v45 = vld [vmem:[%s1387_s29 + $0x20] sm:$0xff] }
  0x3c   : > { %v358_v46 = vld [vmem:[%s1387_s29 + $0x28] sm:$0xff]  ;;  %v359_v47 = vld [vmem:[%s1387_s29 + $0x30] sm:$0xff]  ;;  %v360_v48 = vld [vmem:[%s1387_s29 + $0x38] sm:$0xff] }
  0x3d   : > { %1105 = vmatpush3.bf16.msra.mxu0 %v1102_v22  ;;  %v361_v49 = vld [vmem:[%s1387_s29 + $0x40] sm:$0xff]  ;;  %v362_v50 = vld [vmem:[%s1387_s29 + $0x48] sm:$0xff]  ;;  %v363_v51 = vld [vmem:[%s1387_s29 + $0x50] sm:$0xff] }
  0x3e   : > { %1107 = vmatprep.subr.bf16.mxu0 %v1106_v25  ;;  %v364_v52 = vld [vmem:[%s1387_s29 + $0x58] sm:$0xff]  ;;  %v365_v53 = vld [vmem:[%s1387_s29 + $0x60] sm:$0xff]  ;;  %v366_v54 = vld [vmem:[%s1387_s29 + $0x68] sm:$0xff] }
  0x3f   : > { %v367_v55 = vld [vmem:[%s1387_s29 + $0x70] sm:$0xff]  ;;  %v368_v56 = vld [vmem:[%s1387_s29 + $0x78] sm:$0xff]  ;;  %v546_v57 = vld [vmem:[%s1394_s15] sm:$0xff] }
  0x40   : > { %1074 = vmatprep.mubr.f32.mxu1 %v546_v57  ;;  %v547_v18 = vld [vmem:[%s1394_s15 + $0x8] sm:$0xff]  ;;  %v548_v19 = vld [vmem:[%s1394_s15 + $0x10] sm:$0xff]  ;;  %v549_v20 = vld [vmem:[%s1394_s15 + $0x18] sm:$0xff] }
  0x41   : > { %1109 = vmatpush3.bf16.msra.mxu0 %v1106_v25  ;;  %v550_v21 = vld [vmem:[%s1394_s15 + $0x20] sm:$0xff]  ;;  %v551_v22 = vld [vmem:[%s1394_s15 + $0x28] sm:$0xff]  ;;  %v552_v23 = vld [vmem:[%s1394_s15 + $0x30] sm:$0xff] }
  0x42   : > { %1111 = vmatprep.subr.bf16.mxu0 %v1110_v29  ;;  %v553_v24 = vld [vmem:[%s1394_s15 + $0x38] sm:$0xff]  ;;  %v554_v25 = vld [vmem:[%s1394_s15 + $0x40] sm:$0xff]  ;;  %v555_v26 = vld [vmem:[%s1394_s15 + $0x48] sm:$0xff] }
  0x43   : > { %v556_v27 = vld [vmem:[%s1394_s15 + $0x50] sm:$0xff]  ;;  %v557_v28 = vld [vmem:[%s1394_s15 + $0x58] sm:$0xff]  ;;  %v559_v30 = vld [vmem:[%s1394_s15 + $0x68] sm:$0xff] }
  0x44   : > { %v560_v31 = vld [vmem:[%s1394_s15 + $0x70] sm:$0xff]  ;;  %v531_v33 = vld [vmem:[#allocation2 + $0x8] sm:$0xff]  ;;  %v530_v34 = vld [vmem:[#allocation2] sm:$0xff] }
  0x45   : > { %1113 = vmatpush3.bf16.msra.mxu0 %v1110_v29  ;;  %v558_v29 = vld [vmem:[%s1394_s15 + $0x60] sm:$0xff]  ;;  %v533_v39 = vld [vmem:[#allocation2 + $0x18] sm:$0xff]  ;;  %v532_v40 = vld [vmem:[#allocation2 + $0x10] sm:$0xff] }
  0x46   : > { %1115 = vmatprep.subr.bf16.mxu0 %v1114_v32  ;;  %v539_v57 = vld [vmem:[#allocation2 + $0x48] sm:$0xff] }
  0x49   : > { %1117 = vmatpush3.bf16.msra.mxu0 %v1114_v32  ;;  %v561_v32 = vld [vmem:[%s1394_s15 + $0x78] sm:$0xff] }
  0x4a   : > { %1119 = vmatprep.subr.bf16.mxu0 %v1118_v35 }
  0x4d   : > { %1121 = vmatpush3.bf16.msra.mxu0 %v1118_v35 }
  0x4e   : > { %1123 = vmatprep.subr.bf16.mxu0 %v1122_v38 }
  0x51   : > { %1125 = vmatpush3.bf16.msra.mxu0 %v1122_v38 }
  0x52   : > { %1127 = vmatprep.subr.bf16.mxu0 %v1126_v41 }
  0x55   : > { %1129 = vmatpush3.bf16.msra.mxu0 %v1126_v41 }
  0x58   : > { %1019 = vmatmul.mubr.f32.vlgmr.msra.gmra.mrb[0].mxu0 %v354_v42 }
  0x59   : > { %1021 = vmatprep.mubr.f32.mxu0 %v355_v43 }
  0x5c   : > { %1022 = vmatmul.mubr.f32.gmra.mrb[2].mxu0 %v356_v44 }
  0x5d   : > { %1024 = vmatprep.mubr.f32.mxu0 %v357_v45  ;;  %v535_v45 = vld [vmem:[#allocation2 + $0x28] sm:$0xff] }
  0x60   : > { %1025 = vmatmul.mubr.f32.gmra.mrb[4].mxu0 %v358_v46  ;;  %v534_v46 = vld [vmem:[#allocation2 + $0x20] sm:$0xff] }
  0x61   : > { %1027 = vmatprep.mubr.f32.mxu0 %v359_v47 }
  0x64   : > { %1028 = vmatmul.mubr.f32.gmra.mrb[6].mxu0 %v360_v48 }
  0x65   : > { %1030 = vmatprep.mubr.f32.mxu0 %v361_v49 }
  0x68   : > { %1031 = vmatmul.mubr.f32.gmra.mrb[8].mxu0 %v362_v50 }
  0x69   : > { %1033 = vmatprep.mubr.f32.mxu0 %v363_v51  ;;  %v537_v51 = vld [vmem:[#allocation2 + $0x38] sm:$0xff] }
  0x6c   : > { %1034 = vmatmul.mubr.f32.gmra.mrb[10].mxu0 %v364_v52  ;;  %v536_v52 = vld [vmem:[#allocation2 + $0x30] sm:$0xff] }
  0x6d   : > { %1036 = vmatprep.mubr.f32.mxu0 %v365_v53 }
  0x70   : > { %1037 = vmatmul.mubr.f32.gmra.mrb[12].mxu0 %v366_v54 }
  0x71   : > { %1039 = vmatprep.mubr.f32.mxu0 %v367_v55 }
  0x74   : > { %1040 = vmatmul.mubr.f32.gmra.mrb[14].mxu0 %v368_v56 }
 0x12b   : > { %v1020_v58 = vpop.f32.mrb[0].mxu0 }
 0x12c   : > { %v451_v59 = vpop.f32.mrb[1].mxu0 }
 0x12d   : > { %v1130_v60 = vpack.c.bf16 %v1020_v58, %v451_v59  ;;  %v538_v58 = vld [vmem:[#allocation2 + $0x40] sm:$0xff] }
 0x12f   : > { %v1023_v61 = vpop.f32.mrb[2].mxu0  ;;  %1131 = vmatprep.subr.bf16.mxu1 %v1130_v60 }
 0x130   : > { %v461_v62 = vpop.f32.mrb[3].mxu0  ;;  %1133 = vmatpush3.bf16.msra.mxu1 %v1130_v60 }
 0x131   : > { %v1134_v63 = vpack.c.bf16 %v1023_v61, %v461_v62 }
 0x133   : > { %v1026_v0 = vpop.f32.mrb[4].mxu0  ;;  %1135 = vmatprep.subr.bf16.mxu1 %v1134_v63 }
 0x134   : > { %v471_v1 = vpop.f32.mrb[5].mxu0  ;;  %1137 = vmatpush3.bf16.msra.mxu1 %v1134_v63  ;;  %v541_v63 = vld [vmem:[#allocation2 + $0x58] sm:$0xff] }
 0x135   : > { %v1138_v2 = vpack.c.bf16 %v1026_v0, %v471_v1  ;;  %v540_v0 = vld [vmem:[#allocation2 + $0x50] sm:$0xff] }
 0x137   : > { %v1029_v3 = vpop.f32.mrb[6].mxu0  ;;  %1139 = vmatprep.subr.bf16.mxu1 %v1138_v2 }
 0x138   : > { %v481_v4 = vpop.f32.mrb[7].mxu0  ;;  %1141 = vmatpush3.bf16.msra.mxu1 %v1138_v2 }
 0x139   : > { %v1142_v5 = vpack.c.bf16 %v1029_v3, %v481_v4 }
 0x13b   : > { %v1032_v6 = vpop.f32.mrb[8].mxu0  ;;  %1143 = vmatprep.subr.bf16.mxu1 %v1142_v5 }
 0x13c   : > { %v491_v7 = vpop.f32.mrb[9].mxu0  ;;  %1145 = vmatpush3.bf16.msra.mxu1 %v1142_v5  ;;  %v543_v5 = vld [vmem:[#allocation2 + $0x68] sm:$0xff] }
 0x13d   : > { %v1146_v8 = vpack.c.bf16 %v1032_v6, %v491_v7  ;;  %v542_v6 = vld [vmem:[#allocation2 + $0x60] sm:$0xff] }
 0x13f   : > { %v1035_v9 = vpop.f32.mrb[10].mxu0  ;;  %1147 = vmatprep.subr.bf16.mxu1 %v1146_v8 }
 0x140   : > { %v501_v10 = vpop.f32.mrb[11].mxu0  ;;  %1149 = vmatpush3.bf16.msra.mxu1 %v1146_v8 }
 0x141   : > { %v1150_v11 = vpack.c.bf16 %v1035_v9, %v501_v10 }
 0x143   : > { %v1038_v12 = vpop.f32.mrb[12].mxu0  ;;  %1151 = vmatprep.subr.bf16.mxu1 %v1150_v11 }
 0x144   : > { %v511_v13 = vpop.f32.mrb[13].mxu0  ;;  %1153 = vmatpush3.bf16.msra.mxu1 %v1150_v11  ;;  %v545_v11 = vld [vmem:[#allocation2 + $0x78] sm:$0xff] }
 0x145   : > { %v1154_v14 = vpack.c.bf16 %v1038_v12, %v511_v13  ;;  %v544_v12 = vld [vmem:[#allocation2 + $0x70] sm:$0xff] }
 0x147   : > { %v1041_v15 = vpop.f32.mrb[14].mxu0  ;;  %1155 = vmatprep.subr.bf16.mxu1 %v1154_v14 }
 0x148   : > { %v521_v16 = vpop.f32.mrb[15].mxu0  ;;  %1157 = vmatpush3.bf16.msra.mxu1 %v1154_v14 }
 0x149   : > { %v1158_v17 = vpack.c.bf16 %v1041_v15, %v521_v16 }
 0x14b   : > { %1159 = vmatprep.subr.bf16.mxu1 %v1158_v17 }
 0x14c   : > { %1161 = vmatpush3.bf16.msra.mxu1 %v1158_v17 }
 0x14f   : > { %1075 = vmatmul.mubr.f32.vlgmr.msra.gmra.mrb[0].mxu1 %v547_v18  ;;  %v918_v18 = vld [vmem:[%s1521_s3] ss:$0 sm:$0xff] (!%p917_p13) }
 0x150   : > { %1077 = vmatprep.mubr.f32.mxu1 %v548_v19 }
 0x153   : > { %1078 = vmatmul.mubr.f32.gmra.mrb[2].mxu1 %v549_v20 }
 0x154   : > { %1080 = vmatprep.mubr.f32.mxu1 %v550_v21 }
 0x157   : > { %1081 = vmatmul.mubr.f32.gmra.mrb[4].mxu1 %v551_v22 }
 0x158   : > { %1083 = vmatprep.mubr.f32.mxu1 %v552_v23 }
 0x15b   : > { %1084 = vmatmul.mubr.f32.gmra.mrb[6].mxu1 %v553_v24 }
 0x15c   : > { %1086 = vmatprep.mubr.f32.mxu1 %v554_v25 }
 0x15f   : > { %1087 = vmatmul.mubr.f32.gmra.mrb[8].mxu1 %v555_v26 }
 0x160   : > { %1089 = vmatprep.mubr.f32.mxu1 %v556_v27 }
 0x163   : > { %1090 = vmatmul.mubr.f32.gmra.mrb[10].mxu1 %v557_v28 }
 0x164   : > { %1092 = vmatprep.mubr.f32.mxu1 %v558_v29 }
 0x167   : > { %1093 = vmatmul.mubr.f32.gmra.mrb[12].mxu1 %v559_v30 }
 0x168   : > { %1095 = vmatprep.mubr.f32.mxu1 %v560_v31 }
 0x16b   : > { %1096 = vmatmul.mubr.f32.gmra.mrb[14].mxu1 %v561_v32 }
 0x222   : > { %v1076_v35 = vpop.f32.mrb[0].mxu1 }
 0x223   : > { %v708_v36 = vadd.f32 %v1076_v35, %v531_v33  ;;  %v628_v37 = vpop.f32.mrb[1].mxu1 }
 0x224   : > { %v707_v38 = vadd.f32 %v628_v37, %v530_v34 }
 0x225   : > { %724 = vst [vmem:[#allocation2 + $0x8] sm:$0xff] %v708_v36 }
 0x226   : > { %723 = vst [vmem:[#allocation2] sm:$0xff] %v707_v38  ;;  %v1079_v41 = vpop.f32.mrb[2].mxu1 }
 0x227   : > { %v710_v42 = vadd.f32 %v1079_v41, %v533_v39  ;;  %v638_v43 = vpop.f32.mrb[3].mxu1 }
 0x228   : > { %v709_v44 = vadd.f32 %v638_v43, %v532_v40 }
 0x229   : > { %726 = vst [vmem:[#allocation2 + $0x18] sm:$0xff] %v710_v42 }
 0x22a   : > { %725 = vst [vmem:[#allocation2 + $0x10] sm:$0xff] %v709_v44  ;;  %v1082_v47 = vpop.f32.mrb[4].mxu1 }
 0x22b   : > { %v712_v48 = vadd.f32 %v1082_v47, %v535_v45  ;;  %v648_v49 = vpop.f32.mrb[5].mxu1 }
 0x22c   : > { %v711_v50 = vadd.f32 %v648_v49, %v534_v46  ;;  %v744_v19 = vld [vmem:[#allocation2 + $0x8] sm:$0xff] (!%p917_p13) }
 0x22d   : > { %728 = vst [vmem:[#allocation2 + $0x28] sm:$0xff] %v712_v48  ;;  %v743_v17 = vld [vmem:[#allocation2] sm:$0xff] (!%p917_p13)  ;;  %v767_v21 = vadd.f32 (!%p917_p13), %v918_v18, %v744_v19 }
 0x22e   : > { %727 = vst [vmem:[#allocation2 + $0x20] sm:$0xff] %v711_v50  ;;  %v1085_v53 = vpop.f32.mrb[6].mxu1  ;;  %v766_v20 = vadd.f32 (!%p917_p13), %v918_v18, %v743_v17 }
 0x22f   : > { %v714_v54 = vadd.f32 %v1085_v53, %v537_v51  ;;  %v658_v55 = vpop.f32.mrb[7].mxu1  ;;  %v783_v32 = vmax.f32 (!%p917_p13), %v767_v21, 0.0 }
 0x230   : > { %v713_v56 = vadd.f32 %v658_v55, %v536_v52  ;;  %v746_v23 = vld [vmem:[#allocation2 + $0x18] sm:$0xff] (!%p917_p13)  ;;  %v782_v31 = vmax.f32 (!%p917_p13), %v766_v20, 0.0 }
 0x231   : > { %730 = vst [vmem:[#allocation2 + $0x38] sm:$0xff] %v714_v54  ;;  %v745_v22 = vld [vmem:[#allocation2 + $0x10] sm:$0xff] (!%p917_p13)  ;;  %v769_v26 = vadd.f32 (!%p917_p13), %v918_v18, %v746_v23  ;;  %799 = vst [vmem:[%s1392_s7 + $0x8] sm:$0xff] (!%p917_p13), %v783_v32 }
 0x232   : > { %729 = vst [vmem:[#allocation2 + $0x30] sm:$0xff] %v713_v56  ;;  %v1088_v59 = vpop.f32.mrb[8].mxu1  ;;  %v768_v25 = vadd.f32 (!%p917_p13), %v918_v18, %v745_v22  ;;  %798 = vst [vmem:[%s1392_s7] sm:$0xff] (!%p917_p13), %v782_v31 }
 0x233   : > { %v716_v60 = vadd.f32 %v1088_v59, %v539_v57  ;;  %v668_v61 = vpop.f32.mrb[9].mxu1  ;;  %v785_v39 = vmax.f32 (!%p917_p13), %v769_v26, 0.0 }
 0x234   : > { %v715_v62 = vadd.f32 %v668_v61, %v538_v58  ;;  %v748_v28 = vld [vmem:[#allocation2 + $0x28] sm:$0xff] (!%p917_p13)  ;;  %v784_v38 = vmax.f32 (!%p917_p13), %v768_v25, 0.0 }
 0x235   : > { %732 = vst [vmem:[#allocation2 + $0x48] sm:$0xff] %v716_v60  ;;  %v747_v24 = vld [vmem:[#allocation2 + $0x20] sm:$0xff] (!%p917_p13)  ;;  %v771_v33 = vadd.f32 (!%p917_p13), %v918_v18, %v748_v28  ;;  %801 = vst [vmem:[%s1392_s7 + $0x18] sm:$0xff] (!%p917_p13), %v785_v39 }
 0x236   : > { %731 = vst [vmem:[#allocation2 + $0x40] sm:$0xff] %v715_v62  ;;  %v1091_v1 = vpop.f32.mrb[10].mxu1  ;;  %v770_v27 = vadd.f32 (!%p917_p13), %v918_v18, %v747_v24  ;;  %800 = vst [vmem:[%s1392_s7 + $0x10] sm:$0xff] (!%p917_p13), %v784_v38 }
 0x237   : > { %v718_v2 = vadd.f32 %v1091_v1, %v541_v63  ;;  %v678_v3 = vpop.f32.mrb[11].mxu1  ;;  %v787_v45 = vmax.f32 (!%p917_p13), %v771_v33, 0.0 }
 0x238   : > { %v717_v4 = vadd.f32 %v678_v3, %v540_v0  ;;  %v750_v30 = vld [vmem:[#allocation2 + $0x38] sm:$0xff] (!%p917_p13)  ;;  %v786_v40 = vmax.f32 (!%p917_p13), %v770_v27, 0.0 }
 0x239   : > { %734 = vst [vmem:[#allocation2 + $0x58] sm:$0xff] %v718_v2  ;;  %v749_v29 = vld [vmem:[#allocation2 + $0x30] sm:$0xff] (!%p917_p13)  ;;  %v773_v41 = vadd.f32 (!%p917_p13), %v918_v18, %v750_v30  ;;  %803 = vst [vmem:[%s1392_s7 + $0x28] sm:$0xff] (!%p917_p13), %v787_v45 }
 0x23a   : > { %733 = vst [vmem:[#allocation2 + $0x50] sm:$0xff] %v717_v4  ;;  %v1094_v7 = vpop.f32.mrb[12].mxu1  ;;  %v772_v34 = vadd.f32 (!%p917_p13), %v918_v18, %v749_v29  ;;  %802 = vst [vmem:[%s1392_s7 + $0x20] sm:$0xff] (!%p917_p13), %v786_v40 }
 0x23b   : > { %v720_v8 = vadd.f32 %v1094_v7, %v543_v5  ;;  %v688_v9 = vpop.f32.mrb[13].mxu1  ;;  %v789_v51 = vmax.f32 (!%p917_p13), %v773_v41, 0.0 }
 0x23c   : > { %v719_v10 = vadd.f32 %v688_v9, %v542_v6  ;;  %742 = sbr.rel (%p917_p13) target bundleno = 591 (0x24f), region = 82  ;;  %v752_v36 = vld [vmem:[#allocation2 + $0x48] sm:$0xff] (!%p917_p13)  ;;  %v788_v46 = vmax.f32 (!%p917_p13), %v772_v34, 0.0 }
 0x23d   : > { %736 = vst [vmem:[#allocation2 + $0x68] sm:$0xff] %v720_v8  ;;  %v751_v35 = vld [vmem:[#allocation2 + $0x40] sm:$0xff] (!%p917_p13)  ;;  %v775_v48 = vadd.f32 (!%p917_p13), %v918_v18, %v752_v36  ;;  %805 = vst [vmem:[%s1392_s7 + $0x38] sm:$0xff] (!%p917_p13), %v789_v51 }
 0x23e   : > { %735 = vst [vmem:[#allocation2 + $0x60] sm:$0xff] %v719_v10  ;;  %v1097_v13 = vpop.f32.mrb[14].mxu1  ;;  %v774_v47 = vadd.f32 (!%p917_p13), %v918_v18, %v751_v35  ;;  %804 = vst [vmem:[%s1392_s7 + $0x30] sm:$0xff] (!%p917_p13), %v788_v46 }
 0x23f   : > { %v722_v14 = vadd.f32 %v1097_v13, %v545_v11  ;;  %v698_v15 = vpop.f32.mrb[15].mxu1  ;;  %v791_v56 = vmax.f32 (!%p917_p13), %v775_v48, 0.0 }
 0x240   : > { %v721_v16 = vadd.f32 %v698_v15, %v544_v12  ;;  %v754_v42 = vld [vmem:[#allocation2 + $0x58] sm:$0xff] (!%p917_p13)  ;;  %v790_v55 = vmax.f32 (!%p917_p13), %v774_v47, 0.0 }
 0x241   : > { %738 = vst [vmem:[#allocation2 + $0x78] sm:$0xff] %v722_v14  ;;  %v753_v37 = vld [vmem:[#allocation2 + $0x50] sm:$0xff] (!%p917_p13)  ;;  %v777_v53 = vadd.f32 (!%p917_p13), %v918_v18, %v754_v42  ;;  %807 = vst [vmem:[%s1392_s7 + $0x48] sm:$0xff] (!%p917_p13), %v791_v56 }
 0x242   : > { %737 = vst [vmem:[#allocation2 + $0x70] sm:$0xff] %v721_v16  ;;  %v776_v52 = vadd.f32 (!%p917_p13), %v918_v18, %v753_v37  ;;  %806 = vst [vmem:[%s1392_s7 + $0x40] sm:$0xff] (!%p917_p13), %v790_v55 }
 0x243   : > { %v793_v60 = vmax.f32 %v777_v53, 0.0 }
 0x244   : > { %v756_v44 = vld [vmem:[#allocation2 + $0x68] sm:$0xff]  ;;  %v792_v59 = vmax.f32 %v776_v52, 0.0 }
 0x245   : > { %v755_v43 = vld [vmem:[#allocation2 + $0x60] sm:$0xff]  ;;  %v779_v57 = vadd.f32 %v918_v18, %v756_v44  ;;  %809 = vst [vmem:[%s1392_s7 + $0x58] sm:$0xff] %v793_v60 }
 0x246   : > { %v778_v54 = vadd.f32 %v918_v18, %v755_v43  ;;  %808 = vst [vmem:[%s1392_s7 + $0x50] sm:$0xff] %v792_v59 }
 0x247   : > { %v795_v63 = vmax.f32 %v779_v57, 0.0 }
 0x248   : > { %v758_v50 = vld [vmem:[#allocation2 + $0x78] sm:$0xff]  ;;  %v794_v61 = vmax.f32 %v778_v54, 0.0 }
 0x249   : > { %v757_v49 = vld [vmem:[#allocation2 + $0x70] sm:$0xff]  ;;  %v781_v62 = vadd.f32 %v918_v18, %v758_v50  ;;  %811 = vst [vmem:[%s1392_s7 + $0x68] sm:$0xff] %v795_v63 }
 0x24a   : > { %v780_v58 = vadd.f32 %v918_v18, %v757_v49  ;;  %810 = vst [vmem:[%s1392_s7 + $0x60] sm:$0xff] %v794_v61 }
 0x24b   : > { %v797_v1 = vmax.f32 %v781_v62, 0.0 }
 0x24c   : > { %v796_v0 = vmax.f32 %v780_v58, 0.0 }
 0x24d   : > { %813 = vst [vmem:[%s1392_s7 + $0x78] sm:$0xff] %v797_v1 }
 0x24e   : > { %812 = vst [vmem:[%s1392_s7 + $0x70] sm:$0xff] %v796_v0 }
 0x24f PF: > { %s14_s21 = sadd.s32 1, %s1273_s21   ;;  %s1523_s15 = smov %s1253_s16 }
 0x250   : > { %p11_p0 = scmp.ge.s32.totalorder %s14_s21, 6   ;;  %s1524_s16 = smov %s1352_s28 }
 0x251   : > { %s1525_s17 = smov %s1265_s19  ;;  %s1526_s18 = smov %s1269_s20 }
 0x252   : > { %s1527_s19 = smov %s1530_s22  ;;  %s1528_s20 = smov %s1534_s23 }
 0x253   :  { %13 = sbr.rel (!%p11_p0) target bundleno = 4 (0x4), region = 120 }

// kernel: gcn_forward.3
= control target key start
LH: loop header
LB: loop body
LE: loop exit
PB: predicated region body
PF: predicated region fallthrough
CT: control target
= control target key end

     0   :  { %s1285_s15 = smov 0   ;;  %s1287_s16 = smov 0   ;;  %s1502_s0 = inlined_call_operand.vmem [shape: f32[256,128], index: 0, kind: input, shape index: {}]   ;;  %s1503_s1 = inlined_call_operand.vmem [shape: f32[128,128], index: 1, kind: input, shape index: {}]   ;;  %s1504_s2 = inlined_call_operand.vmem [shape: f32[256,256], index: 2, kind: input, shape index: {}]   ;;  %s1505_s3 = inlined_call_operand.vmem [shape: f32[1,128], index: 3, kind: input, shape index: {}]   ;;  %s1506_s4 = inlined_call_operand.vmem [shape: f32[256,128], index: 4, kind: output, shape index: {}]  }
   0x1   :  { %s1289_s17 = smov 0   ;;  %s1291_s18 = smov 0  }
   0x2   :  { %s1293_s19 = smov 0   ;;  %s1295_s20 = smov 0  }
   0x3   :  { %s1297_s21 = smov 0  }
   0x4 LB: > { %s23_s22 = sadd.s32 1, %s1249_s19  ;;  %s26_s23 = sadd.s32 1, %s1253_s20  ;;  %s1257_s21 = sphi %s1297_s21, %s14_s21   ;;  %s1253_s20 = sphi %s1295_s20, %s1512_s20   ;;  %s1249_s19 = sphi %s1293_s19, %s1511_s19   ;;  %s1245_s18 = sphi %s1291_s18, %s1510_s18   ;;  %s1241_s17 = sphi %s1289_s17, %s1509_s17   ;;  %s1237_s16 = sphi %s1287_s16, %s1508_s16   ;;  %s1233_s15 = sphi %s1285_s15, %s1507_s15  }
   0x5   : > { %p24_p0 = scmp.ge.s32.totalorder %s23_s22, 2  ;;  %p89_p1 = scmp.ne.s32.totalorder %s1237_s16, %s1233_s15 }
   0x6   : > { %p90_p2 = scmp.eq.s32.totalorder %s1257_s21, 0  ;;  %s82_s27 = sadd.s32 1, %s1237_s16 }
   0x7   : > { %s1514_s22 = smov (%p24_p0, %s23_s22), 0  ;;  %s1516_s23 = smov (!%p24_p0, %s26_s23), %s1253_s20 }
   0x8   : > { %p91_p3 = por %p90_p2, %p89_p1  ;;  %p28_p4 = scmp.ge.s32.totalorder %s1516_s23, 2 }
   0x9   : > { %s78_s24 = ssub.s32 %s1249_s19, %s1514_s22  ;;  %p889_p6 = scmp.ge.s32.totalorder %s1257_s21, 4 }
   0xa   : > { %s1518_s23 = smov (%p28_p4, %s1516_s23), 0 }
   0xb   : > { %s77_s25 = ssub.s32 %s1253_s20, %s1518_s23  ;;  %168 = sbr.rel (%p889_p6) target bundleno = 32 (0x20), region = 24 }
   0xc   : > { %s79_s26 = sor.u32 %s78_s24, %s77_s25 }
   0xd   : > { %p80_p5 = scmp.eq.s32.totalorder %s79_s26, 0 }
   0xf   : > { %s1336_s28 = scalar_select %p80_p5, %s1237_s16, %s82_s27  }
  0x12   : > { %180 = sbr.rel (!%p91_p3) target bundleno = 32 (0x20), region = 32  ;;  %s182_s29 = sand.u32 (%p91_p3), 1, %s1237_s16  }
  0x13   : > { %s905_s30 = sshll.u32 (%p91_p3), %s1253_s20, 5  ;;  %s890_s5 = sshll.u32 (%p91_p3), %s182_s29, 7 }
  0x14   : > { %s187_s6 = sadd.s32 (%p91_p3), %s1249_s19, %s905_s30  ;;  %s184_s11 = scalar_lea.vmem (%p91_p3), [#allocation3], %s890_s5 }
  0x15   : > { %s893_s7 = sshll.u32 (%p91_p3), %s187_s6, 3 }
  0x16   : > { %s1345_s10 = scalar_lea.vmem (%p91_p3), %s1504_s2, %s893_s7 }
  0x17   : > { %v247_v0 = vld [vmem:[%s1345_s10] sm:$0xff] (%p91_p3)  ;;  %v249_v1 = vld [vmem:[%s1345_s10 + $0x10] sm:$0xff] (%p91_p3) }
  0x18   : > { %v251_v2 = vld [vmem:[%s1345_s10 + $0x20] sm:$0xff] (%p91_p3)  ;;  %248 = vst [vmem:[%s184_s11] sm:$0xff] (%p91_p3), %v247_v0  ;;  %250 = vst [vmem:[%s184_s11 + $0x8] sm:$0xff] (%p91_p3), %v249_v1  ;;  %v253_v3 = vld [vmem:[%s1345_s10 + $0x30] sm:$0xff] (%p91_p3) }
  0x19   : > { %252 = vst [vmem:[%s184_s11 + $0x10] sm:$0xff] %v251_v2  ;;  %v255_v4 = vld [vmem:[%s1345_s10 + $0x40] sm:$0xff]  ;;  %v257_v5 = vld [vmem:[%s1345_s10 + $0x50] sm:$0xff]  ;;  %254 = vst [vmem:[%s184_s11 + $0x18] sm:$0xff] %v253_v3 }
  0x1a   : > { %256 = vst [vmem:[%s184_s11 + $0x20] sm:$0xff] %v255_v4  ;;  %258 = vst [vmem:[%s184_s11 + $0x28] sm:$0xff] %v257_v5  ;;  %v259_v6 = vld [vmem:[%s1345_s10 + $0x60] sm:$0xff]  ;;  %v261_v7 = vld [vmem:[%s1345_s10 + $0x70] sm:$0xff] }
  0x1b   : > { %v263_v8 = vld [vmem:[%s1345_s10 + $0x80] sm:$0xff]  ;;  %260 = vst [vmem:[%s184_s11 + $0x30] sm:$0xff] %v259_v6  ;;  %262 = vst [vmem:[%s184_s11 + $0x38] sm:$0xff] %v261_v7  ;;  %v265_v9 = vld [vmem:[%s1345_s10 + $0x90] sm:$0xff] }
  0x1c   : > { %264 = vst [vmem:[%s184_s11 + $0x40] sm:$0xff] %v263_v8  ;;  %v267_v10 = vld [vmem:[%s1345_s10 + $0xa0] sm:$0xff]  ;;  %v269_v11 = vld [vmem:[%s1345_s10 + $0xb0] sm:$0xff]  ;;  %266 = vst [vmem:[%s184_s11 + $0x48] sm:$0xff] %v265_v9 }
  0x1d   : > { %268 = vst [vmem:[%s184_s11 + $0x50] sm:$0xff] %v267_v10  ;;  %270 = vst [vmem:[%s184_s11 + $0x58] sm:$0xff] %v269_v11  ;;  %v271_v12 = vld [vmem:[%s1345_s10 + $0xc0] sm:$0xff]  ;;  %v273_v13 = vld [vmem:[%s1345_s10 + $0xd0] sm:$0xff] }
  0x1e   : > { %v275_v14 = vld [vmem:[%s1345_s10 + $0xe0] sm:$0xff]  ;;  %272 = vst [vmem:[%s184_s11 + $0x60] sm:$0xff] %v271_v12  ;;  %274 = vst [vmem:[%s184_s11 + $0x68] sm:$0xff] %v273_v13  ;;  %v277_v15 = vld [vmem:[%s1345_s10 + $0xf0] sm:$0xff] }
  0x1f   : > { %276 = vst [vmem:[%s184_s11 + $0x70] sm:$0xff] %v275_v14  ;;  %278 = vst [vmem:[%s184_s11 + $0x78] sm:$0xff] %v277_v15 }
  0x20 PF: > { %p894_p7 = scmp.ge.s32.totalorder %s1257_s21, 1  ;;  %p283_p8 = scmp.lt.s32.totalorder %s1257_s21, 5 }
  0x22   : > { %p284_p9 = pnand %p894_p7, %p283_p8 }
  0x23   : > { %s290_s12 = sand.u32 (!%p284_p9), 1, %s1233_s15   ;;  %s896_s13 = sshll.u32 (!%p284_p9), %s1241_s17, 4 }
  0x24   : > { %287 = sbr.rel (%p284_p9) target bundleno = 589 (0x24d), region = 70  ;;  %s895_s14 = sshll.u32 (!%p284_p9), %s290_s12, 7 }
  0x25   : > { %p321_p10 = scmp.lt.s32.totalorder (!%p284_p9), %s896_s13, 31  ;;  %s898_s24 = sshll.u32 (!%p284_p9), %s1245_s18, 4 }
  0x26   : > { %p328_p11 = scmp.lt.s32.totalorder (!%p284_p9), %s898_s24, 31  ;;  %s1378_s15 = scalar_lea.vmem (!%p284_p9), [#allocation3], %s895_s14 }
  0x27   : > { %p900_p12 = scmp.ne.s32.totalorder (!%p284_p9), %s1241_s17, 0 }
  0x2b   : > { %s1520_s13 = smov (!%p321_p10, %s896_s13), 31  ;;  %s1522_s24 = smov (!%p328_p11, %s898_s24), 31 }
  0x2c   : > { %s897_s25 = sshll.u32 %s1520_s13, 3  ;;  %s899_s30 = sshll.u32 %s1522_s24, 3  ;;  %v1259_v16 = vmov (!%p900_p12), 0.0  }
  0x2d   : > { %s1371_s29 = scalar_lea.vmem %s1502_s0, %s897_s25  ;;  %s1376_s7 = scalar_lea.vmem %s1506_s4, %s899_s30  ;;  %337 = vst [vmem:[#allocation2] sm:$0xff] (!%p900_p12), %v1259_v16  ;;  %338 = vst [vmem:[#allocation2 + $0x8] sm:$0xff] (!%p900_p12), %v1259_v16 }
  0x2e   : > { %336 = sbr.rel (%p900_p12) target bundleno = 53 (0x35), region = 78  ;;  %339 = vst [vmem:[#allocation2 + $0x10] sm:$0xff] (!%p900_p12), %v1259_v16  ;;  %340 = vst [vmem:[#allocation2 + $0x18] sm:$0xff] (!%p900_p12), %v1259_v16 }
  0x2f   : > { %341 = vst [vmem:[#allocation2 + $0x20] sm:$0xff] (!%p900_p12), %v1259_v16  ;;  %342 = vst [vmem:[#allocation2 + $0x28] sm:$0xff] (!%p900_p12), %v1259_v16 }
  0x30   : > { %343 = vst [vmem:[#allocation2 + $0x30] sm:$0xff] (!%p900_p12), %v1259_v16  ;;  %344 = vst [vmem:[#allocation2 + $0x38] sm:$0xff] (!%p900_p12), %v1259_v16 }
  0x31   : > { %345 = vst [vmem:[#allocation2 + $0x40] sm:$0xff] (!%p900_p12), %v1259_v16  ;;  %346 = vst [vmem:[#allocation2 + $0x48] sm:$0xff] (!%p900_p12), %v1259_v16 }
  0x32   : > { %347 = vst [vmem:[#allocation2 + $0x50] sm:$0xff] (!%p900_p12), %v1259_v16  ;;  %348 = vst [vmem:[#allocation2 + $0x58] sm:$0xff] (!%p900_p12), %v1259_v16 }
  0x33   : > { %349 = vst [vmem:[#allocation2 + $0x60] sm:$0xff] (!%p900_p12), %v1259_v16  ;;  %350 = vst [vmem:[#allocation2 + $0x68] sm:$0xff] (!%p900_p12), %v1259_v16 }
  0x34   : > { %351 = vst [vmem:[#allocation2 + $0x70] sm:$0xff] (!%p900_p12), %v1259_v16  ;;  %352 = vst [vmem:[#allocation2 + $0x78] sm:$0xff] (!%p900_p12), %v1259_v16 }
  0x35 PF: > { %v369_v17 = vld [vmem:[%s1503_s1] sm:$0xff]  ;;  %v370_v18 = vld [vmem:[%s1503_s1 + $0x8] sm:$0xff]  ;;  %v371_v19 = vld [vmem:[%s1503_s1 + $0x10] sm:$0xff]  ;;  %p901_p13 = scmp.ne.s32.totalorder %s1241_s17, 1 }
  0x36   : > { %v1082_v20 = vpack.c.bf16 %v370_v18, %v369_v17  ;;  %v372_v21 = vld [vmem:[%s1503_s1 + $0x18] sm:$0xff]  ;;  %v373_v23 = vld [vmem:[%s1503_s1 + $0x20] sm:$0xff]  ;;  %v374_v24 = vld [vmem:[%s1503_s1 + $0x28] sm:$0xff] }
  0x37   : > { %v1086_v22 = vpack.c.bf16 %v372_v21, %v371_v19  ;;  %v1090_v25 = vpack.c.bf16 %v374_v24, %v373_v23  ;;  %v353_v26 = vld [vmem:[%s1371_s29] sm:$0xff]  ;;  %v375_v27 = vld [vmem:[%s1503_s1 + $0x30] sm:$0xff]  ;;  %v376_v28 = vld [vmem:[%s1503_s1 + $0x38] sm:$0xff] }
  0x38   : > { %1083 = vmatprep.subr.bf16.mxu0 %v1082_v20  ;;  %1002 = vmatprep.mubr.f32.mxu0 %v353_v26  ;;  %v1094_v29 = vpack.c.bf16 %v376_v28, %v375_v27  ;;  %v377_v30 = vld [vmem:[%s1503_s1 + $0x40] sm:$0xff]  ;;  %v378_v31 = vld [vmem:[%s1503_s1 + $0x48] sm:$0xff]  ;;  %v379_v33 = vld [vmem:[%s1503_s1 + $0x50] sm:$0xff] }
  0x39   : > { %1085 = vmatpush3.bf16.msra.mxu0 %v1082_v20  ;;  %v1098_v32 = vpack.c.bf16 %v378_v31, %v377_v30  ;;  %v380_v34 = vld [vmem:[%s1503_s1 + $0x58] sm:$0xff]  ;;  %v381_v36 = vld [vmem:[%s1503_s1 + $0x60] sm:$0xff]  ;;  %v382_v37 = vld [vmem:[%s1503_s1 + $0x68] sm:$0xff] }
  0x3a   : > { %1087 = vmatprep.subr.bf16.mxu0 %v1086_v22  ;;  %v1102_v35 = vpack.c.bf16 %v380_v34, %v379_v33  ;;  %v1106_v38 = vpack.c.bf16 %v382_v37, %v381_v36  ;;  %v383_v39 = vld [vmem:[%s1503_s1 + $0x70] sm:$0xff]  ;;  %v384_v40 = vld [vmem:[%s1503_s1 + $0x78] sm:$0xff]  ;;  %v354_v42 = vld [vmem:[%s1371_s29 + $0x8] sm:$0xff] }
  0x3b   : > { %v1110_v41 = vpack.c.bf16 %v384_v40, %v383_v39  ;;  %v355_v43 = vld [vmem:[%s1371_s29 + $0x10] sm:$0xff]  ;;  %v356_v44 = vld [vmem:[%s1371_s29 + $0x18] sm:$0xff]  ;;  %v357_v45 = vld [vmem:[%s1371_s29 + $0x20] sm:$0xff] }
  0x3c   : > { %v358_v46 = vld [vmem:[%s1371_s29 + $0x28] sm:$0xff]  ;;  %v359_v47 = vld [vmem:[%s1371_s29 + $0x30] sm:$0xff]  ;;  %v360_v48 = vld [vmem:[%s1371_s29 + $0x38] sm:$0xff] }
  0x3d   : > { %1089 = vmatpush3.bf16.msra.mxu0 %v1086_v22  ;;  %v361_v49 = vld [vmem:[%s1371_s29 + $0x40] sm:$0xff]  ;;  %v362_v50 = vld [vmem:[%s1371_s29 + $0x48] sm:$0xff]  ;;  %v363_v51 = vld [vmem:[%s1371_s29 + $0x50] sm:$0xff] }
  0x3e   : > { %1091 = vmatprep.subr.bf16.mxu0 %v1090_v25  ;;  %v364_v52 = vld [vmem:[%s1371_s29 + $0x58] sm:$0xff]  ;;  %v365_v53 = vld [vmem:[%s1371_s29 + $0x60] sm:$0xff]  ;;  %v366_v54 = vld [vmem:[%s1371_s29 + $0x68] sm:$0xff] }
  0x3f   : > { %v367_v55 = vld [vmem:[%s1371_s29 + $0x70] sm:$0xff]  ;;  %v368_v56 = vld [vmem:[%s1371_s29 + $0x78] sm:$0xff]  ;;  %v546_v57 = vld [vmem:[%s1378_s15] sm:$0xff] }
  0x40   : > { %1058 = vmatprep.mubr.f32.mxu1 %v546_v57  ;;  %v547_v18 = vld [vmem:[%s1378_s15 + $0x8] sm:$0xff]  ;;  %v548_v19 = vld [vmem:[%s1378_s15 + $0x10] sm:$0xff]  ;;  %v549_v20 = vld [vmem:[%s1378_s15 + $0x18] sm:$0xff] }
  0x41   : > { %1093 = vmatpush3.bf16.msra.mxu0 %v1090_v25  ;;  %v550_v21 = vld [vmem:[%s1378_s15 + $0x20] sm:$0xff]  ;;  %v551_v22 = vld [vmem:[%s1378_s15 + $0x28] sm:$0xff]  ;;  %v552_v23 = vld [vmem:[%s1378_s15 + $0x30] sm:$0xff] }
  0x42   : > { %1095 = vmatprep.subr.bf16.mxu0 %v1094_v29  ;;  %v553_v24 = vld [vmem:[%s1378_s15 + $0x38] sm:$0xff]  ;;  %v554_v25 = vld [vmem:[%s1378_s15 + $0x40] sm:$0xff]  ;;  %v555_v26 = vld [vmem:[%s1378_s15 + $0x48] sm:$0xff] }
  0x43   : > { %v556_v27 = vld [vmem:[%s1378_s15 + $0x50] sm:$0xff]  ;;  %v557_v28 = vld [vmem:[%s1378_s15 + $0x58] sm:$0xff]  ;;  %v559_v30 = vld [vmem:[%s1378_s15 + $0x68] sm:$0xff] }
  0x44   : > { %v560_v31 = vld [vmem:[%s1378_s15 + $0x70] sm:$0xff]  ;;  %v531_v33 = vld [vmem:[#allocation2 + $0x8] sm:$0xff]  ;;  %v530_v34 = vld [vmem:[#allocation2] sm:$0xff] }
  0x45   : > { %1097 = vmatpush3.bf16.msra.mxu0 %v1094_v29  ;;  %v558_v29 = vld [vmem:[%s1378_s15 + $0x60] sm:$0xff]  ;;  %v533_v39 = vld [vmem:[#allocation2 + $0x18] sm:$0xff]  ;;  %v532_v40 = vld [vmem:[#allocation2 + $0x10] sm:$0xff] }
  0x46   : > { %1099 = vmatprep.subr.bf16.mxu0 %v1098_v32  ;;  %v539_v57 = vld [vmem:[#allocation2 + $0x48] sm:$0xff] }
  0x49   : > { %1101 = vmatpush3.bf16.msra.mxu0 %v1098_v32  ;;  %v561_v32 = vld [vmem:[%s1378_s15 + $0x78] sm:$0xff] }
  0x4a   : > { %1103 = vmatprep.subr.bf16.mxu0 %v1102_v35 }
  0x4d   : > { %1105 = vmatpush3.bf16.msra.mxu0 %v1102_v35 }
  0x4e   : > { %1107 = vmatprep.subr.bf16.mxu0 %v1106_v38 }
  0x51   : > { %1109 = vmatpush3.bf16.msra.mxu0 %v1106_v38 }
  0x52   : > { %1111 = vmatprep.subr.bf16.mxu0 %v1110_v41 }
  0x55   : > { %1113 = vmatpush3.bf16.msra.mxu0 %v1110_v41 }
  0x58   : > { %1003 = vmatmul.mubr.f32.vlgmr.msra.gmra.mrb[0].mxu0 %v354_v42 }
  0x59   : > { %1005 = vmatprep.mubr.f32.mxu0 %v355_v43 }
  0x5c   : > { %1006 = vmatmul.mubr.f32.gmra.mrb[2].mxu0 %v356_v44 }
  0x5d   : > { %1008 = vmatprep.mubr.f32.mxu0 %v357_v45  ;;  %v535_v45 = vld [vmem:[#allocation2 + $0x28] sm:$0xff] }
  0x60   : > { %1009 = vmatmul.mubr.f32.gmra.mrb[4].mxu0 %v358_v46  ;;  %v534_v46 = vld [vmem:[#allocation2 + $0x20] sm:$0xff] }
  0x61   : > { %1011 = vmatprep.mubr.f32.mxu0 %v359_v47 }
  0x64   : > { %1012 = vmatmul.mubr.f32.gmra.mrb[6].mxu0 %v360_v48 }
  0x65   : > { %1014 = vmatprep.mubr.f32.mxu0 %v361_v49 }
  0x68   : > { %1015 = vmatmul.mubr.f32.gmra.mrb[8].mxu0 %v362_v50 }
  0x69   : > { %1017 = vmatprep.mubr.f32.mxu0 %v363_v51  ;;  %v537_v51 = vld [vmem:[#allocation2 + $0x38] sm:$0xff] }
  0x6c   : > { %1018 = vmatmul.mubr.f32.gmra.mrb[10].mxu0 %v364_v52  ;;  %v536_v52 = vld [vmem:[#allocation2 + $0x30] sm:$0xff] }
  0x6d   : > { %1020 = vmatprep.mubr.f32.mxu0 %v365_v53 }
  0x70   : > { %1021 = vmatmul.mubr.f32.gmra.mrb[12].mxu0 %v366_v54 }
  0x71   : > { %1023 = vmatprep.mubr.f32.mxu0 %v367_v55 }
  0x74   : > { %1024 = vmatmul.mubr.f32.gmra.mrb[14].mxu0 %v368_v56 }
 0x12b   : > { %v1004_v58 = vpop.f32.mrb[0].mxu0 }
 0x12c   : > { %v451_v59 = vpop.f32.mrb[1].mxu0 }
 0x12d   : > { %v1114_v60 = vpack.c.bf16 %v1004_v58, %v451_v59  ;;  %v538_v58 = vld [vmem:[#allocation2 + $0x40] sm:$0xff] }
 0x12f   : > { %v1007_v61 = vpop.f32.mrb[2].mxu0  ;;  %1115 = vmatprep.subr.bf16.mxu1 %v1114_v60 }
 0x130   : > { %v461_v62 = vpop.f32.mrb[3].mxu0  ;;  %1117 = vmatpush3.bf16.msra.mxu1 %v1114_v60 }
 0x131   : > { %v1118_v63 = vpack.c.bf16 %v1007_v61, %v461_v62 }
 0x133   : > { %v1010_v0 = vpop.f32.mrb[4].mxu0  ;;  %1119 = vmatprep.subr.bf16.mxu1 %v1118_v63 }
 0x134   : > { %v471_v1 = vpop.f32.mrb[5].mxu0  ;;  %1121 = vmatpush3.bf16.msra.mxu1 %v1118_v63  ;;  %v541_v63 = vld [vmem:[#allocation2 + $0x58] sm:$0xff] }
 0x135   : > { %v1122_v2 = vpack.c.bf16 %v1010_v0, %v471_v1  ;;  %v540_v0 = vld [vmem:[#allocation2 + $0x50] sm:$0xff] }
 0x137   : > { %v1013_v3 = vpop.f32.mrb[6].mxu0  ;;  %1123 = vmatprep.subr.bf16.mxu1 %v1122_v2 }
 0x138   : > { %v481_v4 = vpop.f32.mrb[7].mxu0  ;;  %1125 = vmatpush3.bf16.msra.mxu1 %v1122_v2 }
 0x139   : > { %v1126_v5 = vpack.c.bf16 %v1013_v3, %v481_v4 }
 0x13b   : > { %v1016_v6 = vpop.f32.mrb[8].mxu0  ;;  %1127 = vmatprep.subr.bf16.mxu1 %v1126_v5 }
 0x13c   : > { %v491_v7 = vpop.f32.mrb[9].mxu0  ;;  %1129 = vmatpush3.bf16.msra.mxu1 %v1126_v5  ;;  %v543_v5 = vld [vmem:[#allocation2 + $0x68] sm:$0xff] }
 0x13d   : > { %v1130_v8 = vpack.c.bf16 %v1016_v6, %v491_v7  ;;  %v542_v6 = vld [vmem:[#allocation2 + $0x60] sm:$0xff] }
 0x13f   : > { %v1019_v9 = vpop.f32.mrb[10].mxu0  ;;  %1131 = vmatprep.subr.bf16.mxu1 %v1130_v8 }
 0x140   : > { %v501_v10 = vpop.f32.mrb[11].mxu0  ;;  %1133 = vmatpush3.bf16.msra.mxu1 %v1130_v8 }
 0x141   : > { %v1134_v11 = vpack.c.bf16 %v1019_v9, %v501_v10 }
 0x143   : > { %v1022_v12 = vpop.f32.mrb[12].mxu0  ;;  %1135 = vmatprep.subr.bf16.mxu1 %v1134_v11 }
 0x144   : > { %v511_v13 = vpop.f32.mrb[13].mxu0  ;;  %1137 = vmatpush3.bf16.msra.mxu1 %v1134_v11  ;;  %v545_v11 = vld [vmem:[#allocation2 + $0x78] sm:$0xff] }
 0x145   : > { %v1138_v14 = vpack.c.bf16 %v1022_v12, %v511_v13  ;;  %v544_v12 = vld [vmem:[#allocation2 + $0x70] sm:$0xff] }
 0x147   : > { %v1025_v15 = vpop.f32.mrb[14].mxu0  ;;  %1139 = vmatprep.subr.bf16.mxu1 %v1138_v14 }
 0x148   : > { %v521_v16 = vpop.f32.mrb[15].mxu0  ;;  %1141 = vmatpush3.bf16.msra.mxu1 %v1138_v14 }
 0x149   : > { %v1142_v17 = vpack.c.bf16 %v1025_v15, %v521_v16 }
 0x14b   : > { %1143 = vmatprep.subr.bf16.mxu1 %v1142_v17 }
 0x14c   : > { %1145 = vmatpush3.bf16.msra.mxu1 %v1142_v17 }
 0x14f   : > { %1059 = vmatmul.mubr.f32.vlgmr.msra.gmra.mrb[0].mxu1 %v547_v18  ;;  %v902_v18 = vld [vmem:[%s1505_s3] ss:$0 sm:$0xff] (!%p901_p13) }
 0x150   : > { %1061 = vmatprep.mubr.f32.mxu1 %v548_v19 }
 0x153   : > { %1062 = vmatmul.mubr.f32.gmra.mrb[2].mxu1 %v549_v20 }
 0x154   : > { %1064 = vmatprep.mubr.f32.mxu1 %v550_v21 }
 0x157   : > { %1065 = vmatmul.mubr.f32.gmra.mrb[4].mxu1 %v551_v22 }
 0x158   : > { %1067 = vmatprep.mubr.f32.mxu1 %v552_v23 }
 0x15b   : > { %1068 = vmatmul.mubr.f32.gmra.mrb[6].mxu1 %v553_v24 }
 0x15c   : > { %1070 = vmatprep.mubr.f32.mxu1 %v554_v25 }
 0x15f   : > { %1071 = vmatmul.mubr.f32.gmra.mrb[8].mxu1 %v555_v26 }
 0x160   : > { %1073 = vmatprep.mubr.f32.mxu1 %v556_v27 }
 0x163   : > { %1074 = vmatmul.mubr.f32.gmra.mrb[10].mxu1 %v557_v28 }
 0x164   : > { %1076 = vmatprep.mubr.f32.mxu1 %v558_v29 }
 0x167   : > { %1077 = vmatmul.mubr.f32.gmra.mrb[12].mxu1 %v559_v30 }
 0x168   : > { %1079 = vmatprep.mubr.f32.mxu1 %v560_v31 }
 0x16b   : > { %1080 = vmatmul.mubr.f32.gmra.mrb[14].mxu1 %v561_v32 }
 0x222   : > { %v1060_v35 = vpop.f32.mrb[0].mxu1 }
 0x223   : > { %v708_v36 = vadd.f32 %v1060_v35, %v531_v33  ;;  %v628_v37 = vpop.f32.mrb[1].mxu1 }
 0x224   : > { %v707_v38 = vadd.f32 %v628_v37, %v530_v34 }
 0x225   : > { %724 = vst [vmem:[#allocation2 + $0x8] sm:$0xff] %v708_v36 }
 0x226   : > { %723 = vst [vmem:[#allocation2] sm:$0xff] %v707_v38  ;;  %v1063_v41 = vpop.f32.mrb[2].mxu1 }
 0x227   : > { %v710_v42 = vadd.f32 %v1063_v41, %v533_v39  ;;  %v638_v43 = vpop.f32.mrb[3].mxu1 }
 0x228   : > { %v709_v44 = vadd.f32 %v638_v43, %v532_v40 }
 0x229   : > { %726 = vst [vmem:[#allocation2 + $0x18] sm:$0xff] %v710_v42 }
 0x22a   : > { %725 = vst [vmem:[#allocation2 + $0x10] sm:$0xff] %v709_v44  ;;  %v1066_v47 = vpop.f32.mrb[4].mxu1 }
 0x22b   : > { %v712_v48 = vadd.f32 %v1066_v47, %v535_v45  ;;  %v648_v49 = vpop.f32.mrb[5].mxu1 }
 0x22c   : > { %v711_v50 = vadd.f32 %v648_v49, %v534_v46  ;;  %v744_v19 = vld [vmem:[#allocation2 + $0x8] sm:$0xff] (!%p901_p13) }
 0x22d   : > { %728 = vst [vmem:[#allocation2 + $0x28] sm:$0xff] %v712_v48  ;;  %v743_v17 = vld [vmem:[#allocation2] sm:$0xff] (!%p901_p13)  ;;  %v767_v21 = vadd.f32 (!%p901_p13), %v902_v18, %v744_v19 }
 0x22e   : > { %727 = vst [vmem:[#allocation2 + $0x20] sm:$0xff] %v711_v50  ;;  %v1069_v53 = vpop.f32.mrb[6].mxu1  ;;  %v766_v20 = vadd.f32 (!%p901_p13), %v902_v18, %v743_v17 }
 0x22f   : > { %v714_v54 = vadd.f32 %v1069_v53, %v537_v51  ;;  %v658_v55 = vpop.f32.mrb[7].mxu1  ;;  %783 = vst [vmem:[%s1376_s7 + $0x8] sm:$0xff] (!%p901_p13), %v767_v21 }
 0x230   : > { %v713_v56 = vadd.f32 %v658_v55, %v536_v52  ;;  %v746_v23 = vld [vmem:[#allocation2 + $0x18] sm:$0xff] (!%p901_p13)  ;;  %782 = vst [vmem:[%s1376_s7] sm:$0xff] (!%p901_p13), %v766_v20 }
 0x231   : > { %730 = vst [vmem:[#allocation2 + $0x38] sm:$0xff] %v714_v54  ;;  %v745_v22 = vld [vmem:[#allocation2 + $0x10] sm:$0xff] (!%p901_p13)  ;;  %v769_v26 = vadd.f32 (!%p901_p13), %v902_v18, %v746_v23 }
 0x232   : > { %729 = vst [vmem:[#allocation2 + $0x30] sm:$0xff] %v713_v56  ;;  %v1072_v59 = vpop.f32.mrb[8].mxu1  ;;  %v768_v25 = vadd.f32 (!%p901_p13), %v902_v18, %v745_v22 }
 0x233   : > { %v716_v60 = vadd.f32 %v1072_v59, %v539_v57  ;;  %v668_v61 = vpop.f32.mrb[9].mxu1  ;;  %785 = vst [vmem:[%s1376_s7 + $0x18] sm:$0xff] (!%p901_p13), %v769_v26 }
 0x234   : > { %v715_v62 = vadd.f32 %v668_v61, %v538_v58  ;;  %v748_v28 = vld [vmem:[#allocation2 + $0x28] sm:$0xff] (!%p901_p13)  ;;  %784 = vst [vmem:[%s1376_s7 + $0x10] sm:$0xff] (!%p901_p13), %v768_v25 }
 0x235   : > { %732 = vst [vmem:[#allocation2 + $0x48] sm:$0xff] %v716_v60  ;;  %v747_v24 = vld [vmem:[#allocation2 + $0x20] sm:$0xff] (!%p901_p13)  ;;  %v771_v31 = vadd.f32 (!%p901_p13), %v902_v18, %v748_v28 }
 0x236   : > { %731 = vst [vmem:[#allocation2 + $0x40] sm:$0xff] %v715_v62  ;;  %v1075_v1 = vpop.f32.mrb[10].mxu1  ;;  %v770_v27 = vadd.f32 (!%p901_p13), %v902_v18, %v747_v24 }
 0x237   : > { %v718_v2 = vadd.f32 %v1075_v1, %v541_v63  ;;  %v678_v3 = vpop.f32.mrb[11].mxu1  ;;  %787 = vst [vmem:[%s1376_s7 + $0x28] sm:$0xff] (!%p901_p13), %v771_v31 }
 0x238   : > { %v717_v4 = vadd.f32 %v678_v3, %v540_v0  ;;  %v750_v30 = vld [vmem:[#allocation2 + $0x38] sm:$0xff] (!%p901_p13)  ;;  %786 = vst [vmem:[%s1376_s7 + $0x20] sm:$0xff] (!%p901_p13), %v770_v27 }
 0x239   : > { %734 = vst [vmem:[#allocation2 + $0x58] sm:$0xff] %v718_v2  ;;  %v749_v29 = vld [vmem:[#allocation2 + $0x30] sm:$0xff] (!%p901_p13)  ;;  %v773_v33 = vadd.f32 (!%p901_p13), %v902_v18, %v750_v30 }
 0x23a   : > { %733 = vst [vmem:[#allocation2 + $0x50] sm:$0xff] %v717_v4  ;;  %v1078_v7 = vpop.f32.mrb[12].mxu1  ;;  %v772_v32 = vadd.f32 (!%p901_p13), %v902_v18, %v749_v29 }
 0x23b   : > { %v720_v8 = vadd.f32 %v1078_v7, %v543_v5  ;;  %v688_v9 = vpop.f32.mrb[13].mxu1  ;;  %789 = vst [vmem:[%s1376_s7 + $0x38] sm:$0xff] (!%p901_p13), %v773_v33 }
 0x23c   : > { %v719_v10 = vadd.f32 %v688_v9, %v542_v6  ;;  %742 = sbr.rel (%p901_p13) target bundleno = 589 (0x24d), region = 82  ;;  %v752_v35 = vld [vmem:[#allocation2 + $0x48] sm:$0xff] (!%p901_p13)  ;;  %788 = vst [vmem:[%s1376_s7 + $0x30] sm:$0xff] (!%p901_p13), %v772_v32 }
 0x23d   : > { %736 = vst [vmem:[#allocation2 + $0x68] sm:$0xff] %v720_v8  ;;  %v751_v34 = vld [vmem:[#allocation2 + $0x40] sm:$0xff] (!%p901_p13)  ;;  %v775_v38 = vadd.f32 (!%p901_p13), %v902_v18, %v752_v35 }
 0x23e   : > { %735 = vst [vmem:[#allocation2 + $0x60] sm:$0xff] %v719_v10  ;;  %v1081_v13 = vpop.f32.mrb[14].mxu1  ;;  %v774_v37 = vadd.f32 (!%p901_p13), %v902_v18, %v751_v34 }
 0x23f   : > { %v722_v14 = vadd.f32 %v1081_v13, %v545_v11  ;;  %v698_v15 = vpop.f32.mrb[15].mxu1  ;;  %791 = vst [vmem:[%s1376_s7 + $0x48] sm:$0xff] (!%p901_p13), %v775_v38 }
 0x240   : > { %v721_v16 = vadd.f32 %v698_v15, %v544_v12  ;;  %v754_v40 = vld [vmem:[#allocation2 + $0x58] sm:$0xff] (!%p901_p13)  ;;  %790 = vst [vmem:[%s1376_s7 + $0x40] sm:$0xff] (!%p901_p13), %v774_v37 }
 0x241   : > { %738 = vst [vmem:[#allocation2 + $0x78] sm:$0xff] %v722_v14  ;;  %v753_v36 = vld [vmem:[#allocation2 + $0x50] sm:$0xff] (!%p901_p13)  ;;  %v777_v43 = vadd.f32 (!%p901_p13), %v902_v18, %v754_v40 }
 0x242   : > { %737 = vst [vmem:[#allocation2 + $0x70] sm:$0xff] %v721_v16  ;;  %v776_v39 = vadd.f32 (!%p901_p13), %v902_v18, %v753_v36 }
 0x243   : > { %793 = vst [vmem:[%s1376_s7 + $0x58] sm:$0xff] %v777_v43 }
 0x244   : > { %v756_v42 = vld [vmem:[#allocation2 + $0x68] sm:$0xff]  ;;  %792 = vst [vmem:[%s1376_s7 + $0x50] sm:$0xff] %v776_v39 }
 0x245   : > { %v755_v41 = vld [vmem:[#allocation2 + $0x60] sm:$0xff]  ;;  %v779_v45 = vadd.f32 %v902_v18, %v756_v42 }
 0x246   : > { %v778_v44 = vadd.f32 %v902_v18, %v755_v41 }
 0x247   : > { %795 = vst [vmem:[%s1376_s7 + $0x68] sm:$0xff] %v779_v45 }
 0x248   : > { %v758_v47 = vld [vmem:[#allocation2 + $0x78] sm:$0xff]  ;;  %794 = vst [vmem:[%s1376_s7 + $0x60] sm:$0xff] %v778_v44 }
 0x249   : > { %v757_v46 = vld [vmem:[#allocation2 + $0x70] sm:$0xff]  ;;  %v781_v49 = vadd.f32 %v902_v18, %v758_v47 }
 0x24a   : > { %v780_v48 = vadd.f32 %v902_v18, %v757_v46 }
 0x24b   : > { %797 = vst [vmem:[%s1376_s7 + $0x78] sm:$0xff] %v781_v49 }
 0x24c   : > { %796 = vst [vmem:[%s1376_s7 + $0x70] sm:$0xff] %v780_v48 }
 0x24d PF: > { %s14_s21 = sadd.s32 1, %s1257_s21   ;;  %s1507_s15 = smov %s1237_s16 }
 0x24e   : > { %p11_p0 = scmp.ge.s32.totalorder %s14_s21, 6   ;;  %s1508_s16 = smov %s1336_s28 }
 0x24f   : > { %s1509_s17 = smov %s1249_s19  ;;  %s1510_s18 = smov %s1253_s20 }
 0x250   : > { %s1511_s19 = smov %s1514_s22  ;;  %s1512_s20 = smov %s1518_s23 }
 0x251   :  { %13 = sbr.rel (!%p11_p0) target bundleno = 4 (0x4), region = 120 }

</bundles_post_ra>
